<compile_context>
chip_gen: v7x
topology: tpu7x:2x2x1
jax: 0.10.0
libtpu: 0.0.40
codegen_flags: <defaults>
</compile_context>

<pallas_src>
import functools

import jax
import jax.numpy as jnp
from jax.experimental import pallas as pl
from jax.experimental.pallas import tpu as pltpu


def gnetmon_kernel(x_ref, adj_ref, namT_ref, state_ref,
                   w1_ref, b1_ref, w2_ref, b2_ref,
                   wih_o_ref, whh_o_ref, b_obs_ref,
                   wih_u_ref, whh_u_ref, b_upd_ref,
                   out_ref, state_out_ref,
                   *, hidden, iterations, mxu_dtype):
    H = hidden
    f32 = jnp.float32

    x = x_ref[...]                 # (N, F)
    adj = adj_ref[...]             # (N, N) symmetric, zero diagonal (precondition)
    st = state_ref[...]            # (N, 2H) packed [h | c] (module layout)
    h_prev = st[:, :H]
    c_prev = st[:, H:]

    def mm(a, b):
        # MXU matmul; operands cast to mxu_dtype (no-op for f32), f32 accumulate.
        return jnp.dot(a.astype(mxu_dtype), b.astype(mxu_dtype),
                       preferred_element_type=f32)

    # ---- encoder MLP: ReLU on every layer (activation_on_output=True) ----
    h = jnp.maximum(mm(x, w1_ref[...]) + b1_ref[...], 0.0)
    h = jnp.maximum(mm(h, w2_ref[...]) + b2_ref[...], 0.0)

    def lstm_cell(inp, hp, cp, wih_ref, whh_ref, b_ref):
        # Two MXU pushes instead of a lane concat of [inp | hp].
        gates = mm(inp, wih_ref[...]) + mm(hp, whh_ref[...]) + b_ref[...]   # (N, 4H)
        # Lane-dense activations: one tanh + one sigmoid over the full 4H lanes.
        lane = jax.lax.broadcasted_iota(jnp.int32, gates.shape, 1)
        is_g = jnp.logical_and(lane >= 2 * H, lane < 3 * H)
        act = jnp.where(is_g, jnp.tanh(gates), jax.nn.sigmoid(gates))
        i = act[:, :H]
        f = act[:, H:2 * H]
        g = act[:, 2 * H:3 * H]
        o = act[:, 3 * H:]
        c = f * cp + i * g
        return o * jnp.tanh(c), c

    # ---- observation LSTM cell ----
    h, c = lstm_cell(h, h_prev, c_prev, wih_o_ref, whh_o_ref, b_obs_ref)

    # ---- GCN (improved=True) normalization, factored via symmetry ----
    # deg = rowsum(A) + 2 (self-loop weight 2); inv_c == inv_r^T by symmetry, so
    # D^-1/2 (A+2I) D^-1/2 h = inv_r * (A @ (inv_r * h)) + (2/deg) * h.
    deg = jnp.sum(adj, axis=1, keepdims=True) + 2.0      # (N, 1)
    inv_r = jax.lax.rsqrt(deg)
    dterm = 2.0 * inv_r * inv_r
    adj_m = adj.astype(mxu_dtype)

    # ---- message passing iterations + update LSTM (carryover=True) ----
    # GCN linear/bias pre-folded into wih_u / b_upd in the wrapper.
    for _ in range(iterations):
        agg = inv_r * jnp.dot(adj_m, (inv_r * h).astype(mxu_dtype),
                              preferred_element_type=f32) + dterm * h
        h, c = lstm_cell(agg, h, c, wih_u_ref, whh_u_ref, b_upd_ref)

    # ---- output_to_network_obs: (A, N) @ (N, H) ----
    out_ref[...] = mm(namT_ref[...], h)

    # ---- updated state, module-native (N, 2H) = [h | c] in one dense store ----
    state_out_ref[...] = jnp.concatenate([h, c], axis=-1)


def gnetmon_forward(x, mask, nam, state, params, *, hidden, iterations,
                    mxu_dtype=jnp.float32):
    B, N, F = x.shape
    A = nam.shape[-1]
    H = hidden

    # Only layout plumbing: a tiny (B,N,A)->(B,A,N) transpose. No block-diag,
    # no state transposes (state stays in the module's (B,N,2H) layout).
    nam_t = jnp.transpose(nam, (0, 2, 1))

    cast = lambda w: w.astype(mxu_dtype)

    # ---- parameter fusion (exact up to fp reassociation) ----
    wih_u_fused = jnp.dot(params["wgcn"], params["wih_u"])                   # (H, 4H)
    b_obs = params["bih_o"] + params["bhh_o"]                                # (1, 4H)
    b_upd = (jnp.dot(params["bgcn"], params["wih_u"])
             + params["bih_u"] + params["bhh_u"])                            # (1, 4H)

    weights = [cast(params["w1"]), params["b1"],
               cast(params["w2"]), params["b2"],
               cast(params["wih_o"]), cast(params["whh_o"]), b_obs,
               cast(wih_u_fused), cast(params["whh_u"]), b_upd]

    batched_in = [x, mask, nam_t, state]
    batched_specs = [
        pl.BlockSpec((None, N, F), lambda b: (b, 0, 0)),
        pl.BlockSpec((None, N, N), lambda b: (b, 0, 0)),
        pl.BlockSpec((None, A, N), lambda b: (b, 0, 0)),
        pl.BlockSpec((None, N, 2 * H), lambda b: (b, 0, 0)),
    ]
    weight_specs = [pl.BlockSpec(w.shape, lambda b: (0, 0)) for w in weights]

    out_shapes = (
        jax.ShapeDtypeStruct((B, A, H), jnp.float32),
        jax.ShapeDtypeStruct((B, N, 2 * H), jnp.float32),
    )
    out_specs = (
        pl.BlockSpec((None, A, H), lambda b: (b, 0, 0)),
        pl.BlockSpec((None, N, 2 * H), lambda b: (b, 0, 0)),
    )

    kernel = functools.partial(gnetmon_kernel, hidden=H, iterations=iterations,
                               mxu_dtype=mxu_dtype)
    agent_obs, new_state = pl.pallas_call(
        kernel,
        out_shape=out_shapes,
        grid=(B,),
        in_specs=batched_specs + weight_specs,
        out_specs=out_specs,
        compiler_params=pltpu.CompilerParams(
            dimension_semantics=("parallel",)),   # lets v7x use both TensorCores
    )(*batched_in, *weights)

    return agent_obs, new_state


def gnetmon_reference(x, mask, nam, state, params, *, hidden, iterations):
    """Pure-JAX mirror of the original (unfused) module math, for verification."""
    def one(xb, mb, nb, sb):
        hp, cp = sb[:, :hidden], sb[:, hidden:]
        h = jnp.maximum(xb @ params["w1"] + params["b1"], 0.0)
        h = jnp.maximum(h @ params["w2"] + params["b2"], 0.0)

        def cell(inp, hprev, cprev, wih, whh, bih, bhh):
            g = inp @ wih + bih + hprev @ whh + bhh
            i = jax.nn.sigmoid(g[:, :hidden])
            f = jax.nn.sigmoid(g[:, hidden:2 * hidden])
            gg = jnp.tanh(g[:, 2 * hidden:3 * hidden])
            o = jax.nn.sigmoid(g[:, 3 * hidden:])
            c = f * cprev + i * gg
            return o * jnp.tanh(c), c

        h, c = cell(h, hp, cp, params["wih_o"], params["whh_o"],
                    params["bih_o"], params["bhh_o"])
        n = mb.shape[0]
        a_hat = mb + 2.0 * jnp.eye(n, dtype=jnp.float32)
        dr = jnp.sum(a_hat, axis=1, keepdims=True)
        dc = jnp.sum(a_hat, axis=0, keepdims=True)
        norm_adj = jax.lax.rsqrt(dr) * a_hat * jax.lax.rsqrt(dc)
        for _ in range(iterations):
            m = norm_adj @ (h @ params["wgcn"]) + params["bgcn"]
            h, c = cell(m, h, c, params["wih_u"], params["whh_u"],
                        params["bih_u"], params["bhh_u"])
        out = nb.T @ h
        return out, jnp.concatenate([h, c], axis=-1)

    return jax.vmap(one)(x, mask, nam, state)


def init_params(key, in_features, enc_units, hidden):
    ks = jax.random.split(key, 16)
    s = 0.1

    def nrm(k, shape):
        return (s * jax.random.normal(k, shape)).astype(jnp.float32)

    return {
        # encoder MLP (weights stored pre-transposed: (in, out))
        "w1": nrm(ks[0], (in_features, enc_units)),
        "b1": nrm(ks[1], (1, enc_units)),
        "w2": nrm(ks[2], (enc_units, hidden)),
        "b2": nrm(ks[3], (1, hidden)),
        # rnn_obs LSTMCell (weights pre-transposed: (in, 4H))
        "wih_o": nrm(ks[4], (hidden, 4 * hidden)),
        "whh_o": nrm(ks[5], (hidden, 4 * hidden)),
        "bih_o": nrm(ks[6], (1, 4 * hidden)),
        "bhh_o": nrm(ks[7], (1, 4 * hidden)),
        # GCNConv linear + bias
        "wgcn": nrm(ks[8], (hidden, hidden)),
        "bgcn": nrm(ks[9], (1, hidden)),
        # rnn_update LSTMCell
        "wih_u": nrm(ks[10], (hidden, 4 * hidden)),
        "whh_u": nrm(ks[11], (hidden, 4 * hidden)),
        "bih_u": nrm(ks[12], (1, 4 * hidden)),
        "bhh_u": nrm(ks[13], (1, 4 * hidden)),
    }


if __name__ == "__main__":
    B, N, F, H, A = 2, 8, 16, 32, 4      # batch, nodes, in_features, hidden, agents
    ENC = 32                             # encoder_units = (32,)
    ITER = 2                             # message-passing iterations

    key = jax.random.PRNGKey(0)
    k_x, k_m, k_a, k_p = jax.random.split(key, 4)

    x = jax.random.normal(k_x, (B, N, F), dtype=jnp.float32)

    # symmetric binary adjacency with zero diagonal (kernel precondition,
    # same as the reference dense_to_sparse path)
    raw = (jax.random.uniform(k_m, (B, N, N)) < 0.35).astype(jnp.float32)
    mask = jnp.maximum(raw, jnp.transpose(raw, (0, 2, 1)))
    mask = mask * (1.0 - jnp.eye(N, dtype=jnp.float32)[None])

    node_agent_matrix = jax.random.uniform(k_a, (B, N, A), dtype=jnp.float32)

    # state=None in the reference forward -> zeros of shape (B, N, 2H)
    state = jnp.zeros((B, N, 2 * H), dtype=jnp.float32)

    params = init_params(k_p, F, ENC, H)

    # f32 MXU path (bit-for-bit comparable with the f32 reference at 1e-3)
    agent_obs, new_state = gnetmon_forward(
        x, mask, node_agent_matrix, state, params, hidden=H, iterations=ITER)
    jax.block_until_ready((agent_obs, new_state))

    ref_obs, ref_state = gnetmon_reference(
        x, mask, node_agent_matrix, state, params, hidden=H, iterations=ITER)

    assert agent_obs.shape == (B, A, H)
    assert new_state.shape == (B, N, 2 * H)
    assert jnp.allclose(agent_obs, ref_obs, rtol=1e-3, atol=1e-3)
    assert jnp.allclose(new_state, ref_state, rtol=1e-3, atol=1e-3)

    # bf16 MXU-operand path (the throughput lever when H / B*N grow);
    # elementwise/gate/state math stays f32, so only matmul rounding differs.
    obs_bf16, state_bf16 = gnetmon_forward(
        x, mask, node_agent_matrix, state, params, hidden=H, iterations=ITER,
        mxu_dtype=jnp.bfloat16)
    jax.block_until_ready((obs_bf16, state_bf16))
    assert jnp.allclose(obs_bf16, ref_obs, rtol=2e-2, atol=2e-2)
    assert jnp.allclose(state_bf16, ref_state, rtol=2e-2, atol=2e-2)

    # TODO(synk): output_neighbor_hidden / output_global_hidden readouts, GRU /
    # no-carryover variants, and the no_agent_mapping path are not implemented
    # (excluded by this module configuration).

    print("KERNEL_OK")
</pallas_src>

<mosaic_0001>
module attributes {stable_mosaic.version = 11 : i64} {
  func.func @gnetmon_kernel(%arg0: i32, %arg1: memref<1x8x16xf32, #tpu.memory_space<vmem>>, %arg2: memref<1x8x8xf32, #tpu.memory_space<vmem>>, %arg3: memref<1x4x8xf32, #tpu.memory_space<vmem>>, %arg4: memref<1x8x64xf32, #tpu.memory_space<vmem>>, %arg5: memref<16x32xf32, #tpu.memory_space<vmem>>, %arg6: memref<1x32xf32, #tpu.memory_space<vmem>>, %arg7: memref<32x32xf32, #tpu.memory_space<vmem>>, %arg8: memref<1x32xf32, #tpu.memory_space<vmem>>, %arg9: memref<32x128xf32, #tpu.memory_space<vmem>>, %arg10: memref<32x128xf32, #tpu.memory_space<vmem>>, %arg11: memref<1x128xf32, #tpu.memory_space<vmem>>, %arg12: memref<32x128xf32, #tpu.memory_space<vmem>>, %arg13: memref<32x128xf32, #tpu.memory_space<vmem>>, %arg14: memref<1x128xf32, #tpu.memory_space<vmem>>, %arg15: memref<1x4x32xf32, #tpu.memory_space<vmem>>, %arg16: memref<1x8x64xf32, #tpu.memory_space<vmem>>) attributes {dimension_semantics = [#tpu.dimension_semantics<parallel>], iteration_bounds = array<i64: 2>, scalar_prefetch = 0 : i64, scratch_operands = 0 : i64, tpu.core_type = #tpu.core_type<tc>, window_params = [{transform_indices = @transform_0, window_bounds = array<i64: 1, 8, 16>}, {transform_indices = @transform_1, window_bounds = array<i64: 1, 8, 8>}, {transform_indices = @transform_2, window_bounds = array<i64: 1, 4, 8>}, {transform_indices = @transform_3, window_bounds = array<i64: 1, 8, 64>}, {pipeline_mode = #tpu.pipeline_mode<synchronous>, transform_indices = @transform_4, window_bounds = array<i64: 16, 32>}, {pipeline_mode = #tpu.pipeline_mode<synchronous>, transform_indices = @transform_5, window_bounds = array<i64: 1, 32>}, {pipeline_mode = #tpu.pipeline_mode<synchronous>, transform_indices = @transform_6, window_bounds = array<i64: 32, 32>}, {pipeline_mode = #tpu.pipeline_mode<synchronous>, transform_indices = @transform_7, window_bounds = array<i64: 1, 32>}, {pipeline_mode = #tpu.pipeline_mode<synchronous>, transform_indices = @transform_8, window_bounds = array<i64: 32, 128>}, {pipeline_mode = #tpu.pipeline_mode<synchronous>, transform_indices = @transform_9, window_bounds = array<i64: 32, 128>}, {pipeline_mode = #tpu.pipeline_mode<synchronous>, transform_indices = @transform_10, window_bounds = array<i64: 1, 128>}, {pipeline_mode = #tpu.pipeline_mode<synchronous>, transform_indices = @transform_11, window_bounds = array<i64: 32, 128>}, {pipeline_mode = #tpu.pipeline_mode<synchronous>, transform_indices = @transform_12, window_bounds = array<i64: 32, 128>}, {pipeline_mode = #tpu.pipeline_mode<synchronous>, transform_indices = @transform_13, window_bounds = array<i64: 1, 128>}, {transform_indices = @transform_14, window_bounds = array<i64: 1, 4, 32>}, {transform_indices = @transform_15, window_bounds = array<i64: 1, 8, 64>}]} {
    %c0 = arith.constant 0 : index
    %c0_0 = arith.constant 0 : index
    %c0_1 = arith.constant 0 : index
    %0 = vector.load %arg1[%c0, %c0_0, %c0_1] : memref<1x8x16xf32, #tpu.memory_space<vmem>>, vector<1x8x16xf32>
    %1 = vector.shape_cast %0 : vector<1x8x16xf32> to vector<8x16xf32>
    %c0_2 = arith.constant 0 : index
    %c0_3 = arith.constant 0 : index
    %c0_4 = arith.constant 0 : index
    %2 = vector.load %arg2[%c0_2, %c0_3, %c0_4] : memref<1x8x8xf32, #tpu.memory_space<vmem>>, vector<1x8x8xf32>
    %3 = vector.shape_cast %2 : vector<1x8x8xf32> to vector<8x8xf32>
    %c0_5 = arith.constant 0 : index
    %c0_6 = arith.constant 0 : index
    %c0_7 = arith.constant 0 : index
    %4 = vector.load %arg4[%c0_5, %c0_6, %c0_7] : memref<1x8x64xf32, #tpu.memory_space<vmem>>, vector<1x8x64xf32>
    %5 = vector.shape_cast %4 : vector<1x8x64xf32> to vector<8x64xf32>
    %6 = vector.extract_strided_slice %5 {offsets = [0, 0], sizes = [8, 32], strides = [1, 1]} : vector<8x64xf32> to vector<8x32xf32>
    %7 = vector.extract_strided_slice %5 {offsets = [0, 32], sizes = [8, 32], strides = [1, 1]} : vector<8x64xf32> to vector<8x32xf32>
    %c0_8 = arith.constant 0 : index
    %c0_9 = arith.constant 0 : index
    %8 = vector.load %arg5[%c0_8, %c0_9] : memref<16x32xf32, #tpu.memory_space<vmem>>, vector<16x32xf32>
    %cst = arith.constant dense<0.000000e+00> : vector<8x32xf32>
    %9 = tpu.matmul %1, %8, %cst {dimension_numbers = #tpu.dot_dimension_numbers<[1], [0], [0], [1], [0, 0, 1, 1], [], []>} : vector<8x16xf32>, vector<16x32xf32>, vector<8x32xf32> -> vector<8x32xf32>
    %c0_10 = arith.constant 0 : index
    %c0_11 = arith.constant 0 : index
    %10 = vector.load %arg6[%c0_10, %c0_11] : memref<1x32xf32, #tpu.memory_space<vmem>>, vector<1x32xf32>
    %11 = vector.broadcast %10 : vector<1x32xf32> to vector<8x32xf32>
    %12 = arith.addf %9, %11 : vector<8x32xf32>
    %cst_12 = arith.constant 0.000000e+00 : f32
    %13 = vector.broadcast %cst_12 : f32 to vector<8x32xf32>
    %14 = arith.maximumf %12, %13 : vector<8x32xf32>
    %c0_13 = arith.constant 0 : index
    %c0_14 = arith.constant 0 : index
    %15 = vector.load %arg7[%c0_13, %c0_14] : memref<32x32xf32, #tpu.memory_space<vmem>>, vector<32x32xf32>
    %cst_15 = arith.constant dense<0.000000e+00> : vector<8x32xf32>
    %16 = tpu.matmul %14, %15, %cst_15 {dimension_numbers = #tpu.dot_dimension_numbers<[1], [0], [0], [1], [0, 0, 1, 1], [], []>} : vector<8x32xf32>, vector<32x32xf32>, vector<8x32xf32> -> vector<8x32xf32>
    %c0_16 = arith.constant 0 : index
    %c0_17 = arith.constant 0 : index
    %17 = vector.load %arg8[%c0_16, %c0_17] : memref<1x32xf32, #tpu.memory_space<vmem>>, vector<1x32xf32>
    %18 = vector.broadcast %17 : vector<1x32xf32> to vector<8x32xf32>
    %19 = arith.addf %16, %18 : vector<8x32xf32>
    %cst_18 = arith.constant 0.000000e+00 : f32
    %20 = vector.broadcast %cst_18 : f32 to vector<8x32xf32>
    %21 = arith.maximumf %19, %20 : vector<8x32xf32>
    %c0_19 = arith.constant 0 : index
    %c0_20 = arith.constant 0 : index
    %22 = vector.load %arg9[%c0_19, %c0_20] : memref<32x128xf32, #tpu.memory_space<vmem>>, vector<32x128xf32>
    %cst_21 = arith.constant dense<0.000000e+00> : vector<8x128xf32>
    %23 = tpu.matmul %21, %22, %cst_21 {dimension_numbers = #tpu.dot_dimension_numbers<[1], [0], [0], [1], [0, 0, 1, 1], [], []>} : vector<8x32xf32>, vector<32x128xf32>, vector<8x128xf32> -> vector<8x128xf32>
    %c0_22 = arith.constant 0 : index
    %c0_23 = arith.constant 0 : index
    %24 = vector.load %arg10[%c0_22, %c0_23] : memref<32x128xf32, #tpu.memory_space<vmem>>, vector<32x128xf32>
    %cst_24 = arith.constant dense<0.000000e+00> : vector<8x128xf32>
    %25 = tpu.matmul %6, %24, %cst_24 {dimension_numbers = #tpu.dot_dimension_numbers<[1], [0], [0], [1], [0, 0, 1, 1], [], []>} : vector<8x32xf32>, vector<32x128xf32>, vector<8x128xf32> -> vector<8x128xf32>
    %26 = arith.addf %23, %25 : vector<8x128xf32>
    %c0_25 = arith.constant 0 : index
    %c0_26 = arith.constant 0 : index
    %27 = vector.load %arg11[%c0_25, %c0_26] : memref<1x128xf32, #tpu.memory_space<vmem>>, vector<1x128xf32>
    %28 = vector.broadcast %27 : vector<1x128xf32> to vector<8x128xf32>
    %29 = arith.addf %26, %28 : vector<8x128xf32>
    %30 = tpu.iota {dimensions = array<i32: 1>} : vector<8x128xi32>
    %c64_i32 = arith.constant 64 : i32
    %31 = vector.broadcast %c64_i32 : i32 to vector<8x128xi32>
    %32 = arith.cmpi sge, %30, %31 : vector<8x128xi32>
    %c96_i32 = arith.constant 96 : i32
    %33 = vector.broadcast %c96_i32 : i32 to vector<8x128xi32>
    %34 = arith.cmpi slt, %30, %33 : vector<8x128xi32>
    %35 = arith.andi %32, %34 : vector<8x128xi1>
    %36 = math.tanh %29 : vector<8x128xf32>
    %37 = arith.negf %29 : vector<8x128xf32>
    %38 = math.exp %37 : vector<8x128xf32>
    %cst_27 = arith.constant 1.000000e+00 : f32
    %39 = vector.broadcast %cst_27 : f32 to vector<8x128xf32>
    %40 = arith.addf %39, %38 : vector<8x128xf32>
    %41 = arith.divf %39, %40 : vector<8x128xf32>
    %42 = arith.select %35, %36, %41 : vector<8x128xi1>, vector<8x128xf32>
    %43 = vector.extract_strided_slice %42 {offsets = [0, 0], sizes = [8, 32], strides = [1, 1]} : vector<8x128xf32> to vector<8x32xf32>
    %44 = vector.extract_strided_slice %42 {offsets = [0, 32], sizes = [8, 32], strides = [1, 1]} : vector<8x128xf32> to vector<8x32xf32>
    %45 = vector.extract_strided_slice %42 {offsets = [0, 64], sizes = [8, 32], strides = [1, 1]} : vector<8x128xf32> to vector<8x32xf32>
    %46 = vector.extract_strided_slice %42 {offsets = [0, 96], sizes = [8, 32], strides = [1, 1]} : vector<8x128xf32> to vector<8x32xf32>
    %47 = arith.mulf %44, %7 : vector<8x32xf32>
    %48 = arith.mulf %43, %45 : vector<8x32xf32>
    %49 = arith.addf %47, %48 : vector<8x32xf32>
    %50 = math.tanh %49 : vector<8x32xf32>
    %51 = arith.mulf %46, %50 : vector<8x32xf32>
    %cst_28 = arith.constant dense<0.000000e+00> : vector<8xf32>
    %52 = vector.multi_reduction <add>, %3, %cst_28 [1] : vector<8x8xf32> to vector<8xf32>
    %53 = vector.shape_cast %52 : vector<8xf32> to vector<8x1xf32>
    %cst_29 = arith.constant 2.000000e+00 : f32
    %54 = vector.broadcast %cst_29 : f32 to vector<8x1xf32>
    %55 = arith.addf %53, %54 : vector<8x1xf32>
    %56 = math.rsqrt %55 : vector<8x1xf32>
    %cst_30 = arith.constant 2.000000e+00 : f32
    %57 = vector.broadcast %cst_30 : f32 to vector<8x1xf32>
    %58 = arith.mulf %57, %56 : vector<8x1xf32>
    %59 = arith.mulf %58, %56 : vector<8x1xf32>
    %60 = vector.broadcast %56 : vector<8x1xf32> to vector<8x32xf32>
    %61 = arith.mulf %60, %51 : vector<8x32xf32>
    %cst_31 = arith.constant dense<0.000000e+00> : vector<8x32xf32>
    %62 = tpu.matmul %3, %61, %cst_31 {dimension_numbers = #tpu.dot_dimension_numbers<[1], [0], [0], [1], [0, 0, 1, 1], [], []>} : vector<8x8xf32>, vector<8x32xf32>, vector<8x32xf32> -> vector<8x32xf32>
    %63 = vector.broadcast %56 : vector<8x1xf32> to vector<8x32xf32>
    %64 = arith.mulf %63, %62 : vector<8x32xf32>
    %65 = vector.broadcast %59 : vector<8x1xf32> to vector<8x32xf32>
    %66 = arith.mulf %65, %51 : vector<8x32xf32>
    %67 = arith.addf %64, %66 : vector<8x32xf32>
    %c0_32 = arith.constant 0 : index
    %c0_33 = arith.constant 0 : index
    %68 = vector.load %arg12[%c0_32, %c0_33] : memref<32x128xf32, #tpu.memory_space<vmem>>, vector<32x128xf32>
    %cst_34 = arith.constant dense<0.000000e+00> : vector<8x128xf32>
    %69 = tpu.matmul %67, %68, %cst_34 {dimension_numbers = #tpu.dot_dimension_numbers<[1], [0], [0], [1], [0, 0, 1, 1], [], []>} : vector<8x32xf32>, vector<32x128xf32>, vector<8x128xf32> -> vector<8x128xf32>
    %c0_35 = arith.constant 0 : index
    %c0_36 = arith.constant 0 : index
    %70 = vector.load %arg13[%c0_35, %c0_36] : memref<32x128xf32, #tpu.memory_space<vmem>>, vector<32x128xf32>
    %cst_37 = arith.constant dense<0.000000e+00> : vector<8x128xf32>
    %71 = tpu.matmul %51, %70, %cst_37 {dimension_numbers = #tpu.dot_dimension_numbers<[1], [0], [0], [1], [0, 0, 1, 1], [], []>} : vector<8x32xf32>, vector<32x128xf32>, vector<8x128xf32> -> vector<8x128xf32>
    %72 = arith.addf %69, %71 : vector<8x128xf32>
    %c0_38 = arith.constant 0 : index
    %c0_39 = arith.constant 0 : index
    %73 = vector.load %arg14[%c0_38, %c0_39] : memref<1x128xf32, #tpu.memory_space<vmem>>, vector<1x128xf32>
    %74 = vector.broadcast %73 : vector<1x128xf32> to vector<8x128xf32>
    %75 = arith.addf %72, %74 : vector<8x128xf32>
    %76 = tpu.iota {dimensions = array<i32: 1>} : vector<8x128xi32>
    %c64_i32_40 = arith.constant 64 : i32
    %77 = vector.broadcast %c64_i32_40 : i32 to vector<8x128xi32>
    %78 = arith.cmpi sge, %76, %77 : vector<8x128xi32>
    %c96_i32_41 = arith.constant 96 : i32
    %79 = vector.broadcast %c96_i32_41 : i32 to vector<8x128xi32>
    %80 = arith.cmpi slt, %76, %79 : vector<8x128xi32>
    %81 = arith.andi %78, %80 : vector<8x128xi1>
    %82 = math.tanh %75 : vector<8x128xf32>
    %83 = arith.negf %75 : vector<8x128xf32>
    %84 = math.exp %83 : vector<8x128xf32>
    %cst_42 = arith.constant 1.000000e+00 : f32
    %85 = vector.broadcast %cst_42 : f32 to vector<8x128xf32>
    %86 = arith.addf %85, %84 : vector<8x128xf32>
    %87 = arith.divf %85, %86 : vector<8x128xf32>
    %88 = arith.select %81, %82, %87 : vector<8x128xi1>, vector<8x128xf32>
    %89 = vector.extract_strided_slice %88 {offsets = [0, 0], sizes = [8, 32], strides = [1, 1]} : vector<8x128xf32> to vector<8x32xf32>
    %90 = vector.extract_strided_slice %88 {offsets = [0, 32], sizes = [8, 32], strides = [1, 1]} : vector<8x128xf32> to vector<8x32xf32>
    %91 = vector.extract_strided_slice %88 {offsets = [0, 64], sizes = [8, 32], strides = [1, 1]} : vector<8x128xf32> to vector<8x32xf32>
    %92 = vector.extract_strided_slice %88 {offsets = [0, 96], sizes = [8, 32], strides = [1, 1]} : vector<8x128xf32> to vector<8x32xf32>
    %93 = arith.mulf %90, %49 : vector<8x32xf32>
    %94 = arith.mulf %89, %91 : vector<8x32xf32>
    %95 = arith.addf %93, %94 : vector<8x32xf32>
    %96 = math.tanh %95 : vector<8x32xf32>
    %97 = arith.mulf %92, %96 : vector<8x32xf32>
    %98 = vector.broadcast %56 : vector<8x1xf32> to vector<8x32xf32>
    %99 = arith.mulf %98, %97 : vector<8x32xf32>
    %cst_43 = arith.constant dense<0.000000e+00> : vector<8x32xf32>
    %100 = tpu.matmul %3, %99, %cst_43 {dimension_numbers = #tpu.dot_dimension_numbers<[1], [0], [0], [1], [0, 0, 1, 1], [], []>} : vector<8x8xf32>, vector<8x32xf32>, vector<8x32xf32> -> vector<8x32xf32>
    %101 = vector.broadcast %56 : vector<8x1xf32> to vector<8x32xf32>
    %102 = arith.mulf %101, %100 : vector<8x32xf32>
    %103 = vector.broadcast %59 : vector<8x1xf32> to vector<8x32xf32>
    %104 = arith.mulf %103, %97 : vector<8x32xf32>
    %105 = arith.addf %102, %104 : vector<8x32xf32>
    %c0_44 = arith.constant 0 : index
    %c0_45 = arith.constant 0 : index
    %106 = vector.load %arg12[%c0_44, %c0_45] : memref<32x128xf32, #tpu.memory_space<vmem>>, vector<32x128xf32>
    %cst_46 = arith.constant dense<0.000000e+00> : vector<8x128xf32>
    %107 = tpu.matmul %105, %106, %cst_46 {dimension_numbers = #tpu.dot_dimension_numbers<[1], [0], [0], [1], [0, 0, 1, 1], [], []>} : vector<8x32xf32>, vector<32x128xf32>, vector<8x128xf32> -> vector<8x128xf32>
    %c0_47 = arith.constant 0 : index
    %c0_48 = arith.constant 0 : index
    %108 = vector.load %arg13[%c0_47, %c0_48] : memref<32x128xf32, #tpu.memory_space<vmem>>, vector<32x128xf32>
    %cst_49 = arith.constant dense<0.000000e+00> : vector<8x128xf32>
    %109 = tpu.matmul %97, %108, %cst_49 {dimension_numbers = #tpu.dot_dimension_numbers<[1], [0], [0], [1], [0, 0, 1, 1], [], []>} : vector<8x32xf32>, vector<32x128xf32>, vector<8x128xf32> -> vector<8x128xf32>
    %110 = arith.addf %107, %109 : vector<8x128xf32>
    %c0_50 = arith.constant 0 : index
    %c0_51 = arith.constant 0 : index
    %111 = vector.load %arg14[%c0_50, %c0_51] : memref<1x128xf32, #tpu.memory_space<vmem>>, vector<1x128xf32>
    %112 = vector.broadcast %111 : vector<1x128xf32> to vector<8x128xf32>
    %113 = arith.addf %110, %112 : vector<8x128xf32>
    %114 = tpu.iota {dimensions = array<i32: 1>} : vector<8x128xi32>
    %c64_i32_52 = arith.constant 64 : i32
    %115 = vector.broadcast %c64_i32_52 : i32 to vector<8x128xi32>
    %116 = arith.cmpi sge, %114, %115 : vector<8x128xi32>
    %c96_i32_53 = arith.constant 96 : i32
    %117 = vector.broadcast %c96_i32_53 : i32 to vector<8x128xi32>
    %118 = arith.cmpi slt, %114, %117 : vector<8x128xi32>
    %119 = arith.andi %116, %118 : vector<8x128xi1>
    %120 = math.tanh %113 : vector<8x128xf32>
    %121 = arith.negf %113 : vector<8x128xf32>
    %122 = math.exp %121 : vector<8x128xf32>
    %cst_54 = arith.constant 1.000000e+00 : f32
    %123 = vector.broadcast %cst_54 : f32 to vector<8x128xf32>
    %124 = arith.addf %123, %122 : vector<8x128xf32>
    %125 = arith.divf %123, %124 : vector<8x128xf32>
    %126 = arith.select %119, %120, %125 : vector<8x128xi1>, vector<8x128xf32>
    %127 = vector.extract_strided_slice %126 {offsets = [0, 0], sizes = [8, 32], strides = [1, 1]} : vector<8x128xf32> to vector<8x32xf32>
    %128 = vector.extract_strided_slice %126 {offsets = [0, 32], sizes = [8, 32], strides = [1, 1]} : vector<8x128xf32> to vector<8x32xf32>
    %129 = vector.extract_strided_slice %126 {offsets = [0, 64], sizes = [8, 32], strides = [1, 1]} : vector<8x128xf32> to vector<8x32xf32>
    %130 = vector.extract_strided_slice %126 {offsets = [0, 96], sizes = [8, 32], strides = [1, 1]} : vector<8x128xf32> to vector<8x32xf32>
    %131 = arith.mulf %128, %95 : vector<8x32xf32>
    %132 = arith.mulf %127, %129 : vector<8x32xf32>
    %133 = arith.addf %131, %132 : vector<8x32xf32>
    %134 = math.tanh %133 : vector<8x32xf32>
    %135 = arith.mulf %130, %134 : vector<8x32xf32>
    %c0_55 = arith.constant 0 : index
    %c0_56 = arith.constant 0 : index
    %c0_57 = arith.constant 0 : index
    %136 = vector.load %arg3[%c0_55, %c0_56, %c0_57] : memref<1x4x8xf32, #tpu.memory_space<vmem>>, vector<1x4x8xf32>
    %137 = vector.shape_cast %136 : vector<1x4x8xf32> to vector<4x8xf32>
    %cst_58 = arith.constant dense<0.000000e+00> : vector<4x32xf32>
    %138 = tpu.matmul %137, %135, %cst_58 {dimension_numbers = #tpu.dot_dimension_numbers<[1], [0], [0], [1], [0, 0, 1, 1], [], []>} : vector<4x8xf32>, vector<8x32xf32>, vector<4x32xf32> -> vector<4x32xf32>
    %c0_59 = arith.constant 0 : index
    %c0_60 = arith.constant 0 : index
    %c0_61 = arith.constant 0 : index
    %139 = vector.load %arg15[%c0_59, %c0_60, %c0_61] : memref<1x4x32xf32, #tpu.memory_space<vmem>>, vector<1x4x32xf32>
    %140 = vector.shape_cast %139 : vector<1x4x32xf32> to vector<4x32xf32>
    %141 = vector.shape_cast %138 : vector<4x32xf32> to vector<1x4x32xf32>
    tpu.vector_store %arg15[%c0_59, %c0_60, %c0_61], %141 {strides = array<i32>} : memref<1x4x32xf32, #tpu.memory_space<vmem>>, vector<1x4x32xf32>,
    %142 = tpu.concatenate %135, %133 in 1 : vector<8x32xf32>, vector<8x32xf32> -> vector<8x64xf32>
    %c0_62 = arith.constant 0 : index
    %c0_63 = arith.constant 0 : index
    %c0_64 = arith.constant 0 : index
    %143 = vector.load %arg16[%c0_62, %c0_63, %c0_64] : memref<1x8x64xf32, #tpu.memory_space<vmem>>, vector<1x8x64xf32>
    %144 = vector.shape_cast %143 : vector<1x8x64xf32> to vector<8x64xf32>
    %145 = vector.shape_cast %142 : vector<8x64xf32> to vector<1x8x64xf32>
    tpu.vector_store %arg16[%c0_62, %c0_63, %c0_64], %145 {strides = array<i32>} : memref<1x8x64xf32, #tpu.memory_space<vmem>>, vector<1x8x64xf32>,
    return
  }
  func.func @transform_0(%arg0: i32) -> (i32, i32, i32) {
    %c0_i32 = arith.constant 0 : i32
    %c0_i32_0 = arith.constant 0 : i32
    %c0_i32_1 = arith.constant 0 : i32
    return %arg0, %c0_i32, %c0_i32_0 : i32, i32, i32
  }
  func.func @transform_1(%arg0: i32) -> (i32, i32, i32) {
    %c0_i32 = arith.constant 0 : i32
    %c0_i32_0 = arith.constant 0 : i32
    %c0_i32_1 = arith.constant 0 : i32
    return %arg0, %c0_i32, %c0_i32_0 : i32, i32, i32
  }
  func.func @transform_2(%arg0: i32) -> (i32, i32, i32) {
    %c0_i32 = arith.constant 0 : i32
    %c0_i32_0 = arith.constant 0 : i32
    %c0_i32_1 = arith.constant 0 : i32
    return %arg0, %c0_i32, %c0_i32_0 : i32, i32, i32
  }
  func.func @transform_3(%arg0: i32) -> (i32, i32, i32) {
    %c0_i32 = arith.constant 0 : i32
    %c0_i32_0 = arith.constant 0 : i32
    %c0_i32_1 = arith.constant 0 : i32
    return %arg0, %c0_i32, %c0_i32_0 : i32, i32, i32
  }
  func.func @transform_4(%arg0: i32) -> (i32, i32) {
    %c0_i32 = arith.constant 0 : i32
    %c0_i32_0 = arith.constant 0 : i32
    %c0_i32_1 = arith.constant 0 : i32
    return %c0_i32, %c0_i32_0 : i32, i32
  }
  func.func @transform_5(%arg0: i32) -> (i32, i32) {
    %c0_i32 = arith.constant 0 : i32
    %c0_i32_0 = arith.constant 0 : i32
    %c0_i32_1 = arith.constant 0 : i32
    return %c0_i32, %c0_i32_0 : i32, i32
  }
  func.func @transform_6(%arg0: i32) -> (i32, i32) {
    %c0_i32 = arith.constant 0 : i32
    %c0_i32_0 = arith.constant 0 : i32
    %c0_i32_1 = arith.constant 0 : i32
    return %c0_i32, %c0_i32_0 : i32, i32
  }
  func.func @transform_7(%arg0: i32) -> (i32, i32) {
    %c0_i32 = arith.constant 0 : i32
    %c0_i32_0 = arith.constant 0 : i32
    %c0_i32_1 = arith.constant 0 : i32
    return %c0_i32, %c0_i32_0 : i32, i32
  }
  func.func @transform_8(%arg0: i32) -> (i32, i32) {
    %c0_i32 = arith.constant 0 : i32
    %c0_i32_0 = arith.constant 0 : i32
    %c0_i32_1 = arith.constant 0 : i32
    return %c0_i32, %c0_i32_0 : i32, i32
  }
  func.func @transform_9(%arg0: i32) -> (i32, i32) {
    %c0_i32 = arith.constant 0 : i32
    %c0_i32_0 = arith.constant 0 : i32
    %c0_i32_1 = arith.constant 0 : i32
    return %c0_i32, %c0_i32_0 : i32, i32
  }
  func.func @transform_10(%arg0: i32) -> (i32, i32) {
    %c0_i32 = arith.constant 0 : i32
    %c0_i32_0 = arith.constant 0 : i32
    %c0_i32_1 = arith.constant 0 : i32
    return %c0_i32, %c0_i32_0 : i32, i32
  }
  func.func @transform_11(%arg0: i32) -> (i32, i32) {
    %c0_i32 = arith.constant 0 : i32
    %c0_i32_0 = arith.constant 0 : i32
    %c0_i32_1 = arith.constant 0 : i32
    return %c0_i32, %c0_i32_0 : i32, i32
  }
  func.func @transform_12(%arg0: i32) -> (i32, i32) {
    %c0_i32 = arith.constant 0 : i32
    %c0_i32_0 = arith.constant 0 : i32
    %c0_i32_1 = arith.constant 0 : i32
    return %c0_i32, %c0_i32_0 : i32, i32
  }
  func.func @transform_13(%arg0: i32) -> (i32, i32) {
    %c0_i32 = arith.constant 0 : i32
    %c0_i32_0 = arith.constant 0 : i32
    %c0_i32_1 = arith.constant 0 : i32
    return %c0_i32, %c0_i32_0 : i32, i32
  }
  func.func @transform_14(%arg0: i32) -> (i32, i32, i32) {
    %c0_i32 = arith.constant 0 : i32
    %c0_i32_0 = arith.constant 0 : i32
    %c0_i32_1 = arith.constant 0 : i32
    return %arg0, %c0_i32, %c0_i32_0 : i32, i32, i32
  }
  func.func @transform_15(%arg0: i32) -> (i32, i32, i32) {
    %c0_i32 = arith.constant 0 : i32
    %c0_i32_0 = arith.constant 0 : i32
    %c0_i32_1 = arith.constant 0 : i32
    return %arg0, %c0_i32, %c0_i32_0 : i32, i32, i32
  }
}

</mosaic_0001>

<bundles_post_ra>
// kernel: tpu_custom_call.1
= control target key start
LH: loop header
LB: loop body
LE: loop exit
PB: predicated region body
PF: predicated region fallthrough
CT: control target
= control target key end

     0   :  { %s3401_s0 = inlined_call_operand.hbm [shape: f32[2,8,16], index: 0, kind: input, shape index: {}]   ;;  %s3402_s1 = inlined_call_operand.hbm [shape: f32[2,8,8], index: 1, kind: input, shape index: {}]   ;;  %s3403_s2 = inlined_call_operand.hbm [shape: f32[2,4,8], index: 2, kind: input, shape index: {}]   ;;  %s3404_s3 = inlined_call_operand.hbm [shape: f32[2,8,64], index: 3, kind: input, shape index: {}]   ;;  %s3405_s4 = inlined_call_operand.hbm [shape: f32[16,32], index: 4, kind: input, shape index: {}]   ;;  %s3406_s5 = inlined_call_operand.vmem [shape: f32[1,32], index: 5, kind: input, shape index: {}]   ;;  %s3407_s6 = inlined_call_operand.hbm [shape: f32[32,32], index: 6, kind: input, shape index: {}]   ;;  %s3408_s7 = inlined_call_operand.vmem [shape: f32[1,32], index: 7, kind: input, shape index: {}]   ;;  %s3409_s8 = inlined_call_operand.hbm [shape: f32[32,128], index: 8, kind: input, shape index: {}]   ;;  %s3410_s9 = inlined_call_operand.vmem [shape: f32[32,128], index: 9, kind: input, shape index: {}]   ;;  %s3411_s10 = inlined_call_operand.vmem [shape: f32[1,128], index: 10, kind: input, shape index: {}]   ;;  %s3412_s11 = inlined_call_operand.hbm [shape: f32[32,128], index: 11, kind: input, shape index: {}]   ;;  %s3413_s12 = inlined_call_operand.hbm [shape: f32[32,128], index: 12, kind: input, shape index: {}]   ;;  %s3414_s13 = inlined_call_operand.vmem [shape: f32[1,128], index: 13, kind: input, shape index: {}]   ;;  %s3415_s14 = inlined_call_operand.hbm [shape: f32[2,4,32], index: 14, kind: output, shape index: {0}]   ;;  %s3416_s15 = inlined_call_operand.hbm [shape: f32[2,8,64], index: 15, kind: output, shape index: {1}]  }
   0x1   :  { %3442 = sst [smem:[#allocation34_spill]] %s3402_s1 }
   0x2   :  { %3443 = sst [smem:[#allocation35_spill]] %s3405_s4 }
   0x3   :  { %3444 = sst [smem:[#allocation36_spill]] %s3406_s5 }
   0x4   :  { %3445 = sst [smem:[#allocation37_spill]] %s3407_s6 }
   0x5   :  { %3446 = sst [smem:[#allocation38_spill]] %s3408_s7 }
   0x6   :  { %3447 = sst [smem:[#allocation39_spill]] %s3410_s9 }
   0x7   :  { %3448 = sst [smem:[#allocation40_spill]] %s3411_s10 }
   0x8   :  { %3449 = sst [smem:[#allocation41_spill]] %s3412_s11 }
   0x9   :  { %3450 = sst [smem:[#allocation42_spill]] %s3414_s13 }
   0xa   :  { %3451 = sst [smem:[#allocation43_spill]] %s3415_s14 }
   0xb   :  { %3452 = sst [smem:[#allocation44_spill]] %s3416_s15 }
   0xc   :  { %21 = vsyncpa [#allocation3], 0 }
   0xd   :  { %23 = vsyncpa [#allocation3 + $0x1], 0 }
   0xe   :  { %24 = vsyncpa [#allocation6], 0 }
   0xf   :  { %26 = vsyncpa [#allocation6 + $0x1], 0 }
  0x10   :  { %27 = vsyncpa [#allocation9], 0 }
  0x11   :  { %29 = vsyncpa [#allocation9 + $0x1], 0 }
  0x12   :  { %30 = vsyncpa [#allocation12], 0 }
  0x13   :  { %31 = vsyncpa [#allocation15], 0 }
  0x14   :  { %32 = vsyncpa [#allocation4], 0 }
  0x15   :  { %34 = vsyncpa [#allocation4 + $0x1], 0 }
  0x16   :  { %35 = vsyncpa [#allocation19], 0 }
  0x17   :  { %37 = vsyncpa [#allocation19 + $0x1], 0  ;;  %s2802_s18 = smov 0   ;;  %s2804_s19 = smov 0  }
  0x18   :  { %s2806_s20 = smov 0   ;;  %s2808_s21 = smov 0  }
  0x19 LB: > { %3453 = sst [smem:[#allocation28_spill]] %s2690_s18  ;;  %s2704_s22 = smov [#allocation10]   ;;  %s2702_s21 = sphi %s2808_s21, %s3503_s21   ;;  %s2698_s20 = sphi %s2806_s20, %s3505_s20   ;;  %s2694_s19 = sphi %s2804_s19, %s3507_s19   ;;  %s2690_s18 = sphi %s2802_s18, %s3506_s18  }
  0x1a   : > { %3454 = sst [smem:[#allocation29_spill]] %s2698_s20  ;;  %s426_s23 = sshll.u32 %s2704_s22, 4  ;;  %s2828_s23 = int_to_ptr.vmem [resolvable:$true] %s426_s23 }
  0x1b   : > { %s2823_s24 = sadd.s32 4294967295, %s2702_s21   ;;  %p1935_p0 = scmp.ge.s32.totalorder %s2702_s21, 1 }
  0x1c   : > { %p3428_p1 = scmp.eq.s32.totalorder %s2823_s24, 0  ;;  %p414_p2 = scmp.lt.s32.totalorder %s2702_s21, 3 }
  0x1d   : > { %s2705_s26 = smov [#allocation11]   ;;  %s2706_s29 = smov [#allocation14]  }
  0x1e   : > { %p2830_p3 = pnand %p1935_p0, %p414_p2  ;;  %s442_s27 = sshll.u32 %s2705_s26, 4  ;;  %s2843_s27 = int_to_ptr.vmem [resolvable:$true] %s442_s27 }
  0x1f   : > { %s477_s30 = sshll.u32 %s2706_s29, 4  ;;  %s3457_s4 = sld [smem:[#allocation35_spill]]  ;;  %s2845_s30 = int_to_ptr.vmem [resolvable:$true] %s477_s30 }
  0x20   : > { %s3455_s25 = scalar_select %p2830_p3, 1, 0 }
  0x21   : > { %p2206_p5 = pneg %p2830_p3 }
  0x23   : > { %p2839_p6 = pnand %p2206_p5, %p3428_p1 }
  0x25   : > { %s3456_s28 = scalar_select %p2839_p6, 1, 0 }
  0x26   : > { %s2324_s22 = scalar_lea.hbm %s3457_s4, 256  ;;  %p2855_p8 = pneg %p2839_p6 }
  0x27   : > { %p2325_p7 = scmp.ne.s32.totalorder %s3457_s4, %s2324_s22  ;;  %p2331_p11 = scmp.lt.u32.totalorder %s2324_s22, %s3457_s4 }
  0x28   : > { %s3458_s26 = scalar_select %p2855_p8, 1, 0 }
  0x29   : > { %p2327_p9 = pnand %p2855_p8, %p2325_p7 }
  0x2b   : > { %p2328_p10 = pneg %p2327_p9 }
  0x2d   : > { %p2333_p12 = pnand %p2331_p11, %p2328_p10 }
  0x2f   : > { %2336 = shalt.err (!%p2333_p12)
}
  0x30   : > { %s2337_s14 = scalar_lea.vmem %s2828_s23, 256  ;;  %p2345_p5 = scmp.lt.s32.totalorder %s2828_s23, %s2828_s23 }
  0x31   : > { %p2338_p13 = scmp.ne.s32.totalorder %s2828_s23, %s2337_s14  ;;  %p2346_p4 = scmp.lt.s32.totalorder %s2337_s14, %s2337_s14 }
  0x33   : > { %p2340_p0 = pnand %p2338_p13, %p2855_p8  ;;  %p2347_p7 = por %p2346_p4, %p2345_p5 }
  0x35   : > { %p2341_p2 = pneg %p2340_p0 }
  0x37   : > { %p2348_p9 = pnand %p2347_p7, %p2341_p2 }
  0x39   : > { %2351 = shalt.err (!%p2348_p9)
}
  0x3a   : > { %s3421_s15 = smov 128   ;;  %s3423_s13 = smov 8  }
  0x3b   : > { %2209 = dma.hbm_to_vmem [thread:$0]  (!%p2839_p6), %s3457_s4, 256, %s2828_s23, [#allocation9], %s3421_s15, %s3421_s15, %s3423_s13  }
  0x3c   : > { %s3459_s6 = sld [smem:[#allocation37_spill]] }
  0x42   : > { %s2352_s14 = scalar_lea.hbm %s3459_s6, 512 }
  0x43   : > { %p2353_p4 = scmp.ne.s32.totalorder %s3459_s6, %s2352_s14  ;;  %p2359_p12 = scmp.lt.u32.totalorder %s2352_s14, %s3459_s6 }
  0x45   : > { %p2355_p10 = pnand %p2353_p4, %p2855_p8 }
  0x47   : > { %p2356_p11 = pneg %p2355_p10 }
  0x49   : > { %p2361_p13 = pnand %p2359_p12, %p2356_p11 }
  0x4b   : > { %2364 = shalt.err (!%p2361_p13)
}
  0x4c   : > { %s2365_s23 = scalar_lea.vmem %s2843_s27, 512  ;;  %p2373_p7 = scmp.lt.s32.totalorder %s2843_s27, %s2843_s27 }
  0x4d   : > { %p2366_p0 = scmp.ne.s32.totalorder %s2843_s27, %s2365_s23  ;;  %p2374_p9 = scmp.lt.s32.totalorder %s2365_s23, %s2365_s23 }
  0x4f   : > { %p2368_p2 = pnand %p2366_p0, %p2855_p8  ;;  %p2375_p4 = por %p2374_p9, %p2373_p7 }
  0x51   : > { %p2369_p5 = pneg %p2368_p2 }
  0x53   : > { %p2376_p10 = pnand %p2375_p4, %p2369_p5 }
  0x55   : > { %2379 = shalt.err (!%p2376_p10)
}
  0x56   : > { %2212 = dma.hbm_to_vmem [thread:$0]  (!%p2839_p6), %s3459_s6, 512, %s2843_s27, [#allocation12], %s3421_s15, %s3421_s15, %s3423_s13  }
  0x57   : > { %s3460_s11 = sld [smem:[#allocation41_spill]] }
  0x5d   : > { %s2380_s16 = scalar_lea.hbm %s3460_s11, 512 }
  0x5e   : > { %p2381_p11 = scmp.ne.s32.totalorder %s3460_s11, %s2380_s16  ;;  %p2387_p0 = scmp.lt.u32.totalorder %s2380_s16, %s3460_s11 }
  0x60   : > { %p2383_p12 = pnand %p2381_p11, %p2855_p8 }
  0x62   : > { %p2384_p13 = pneg %p2383_p12 }
  0x64   : > { %p2389_p2 = pnand %p2387_p0, %p2384_p13 }
  0x66   : > { %2392 = shalt.err (!%p2389_p2)
}
  0x67   : > { %s2393_s27 = scalar_lea.vmem %s2845_s30, 512  ;;  %p2401_p4 = scmp.lt.s32.totalorder %s2845_s30, %s2845_s30 }
  0x68   : > { %p2394_p5 = scmp.ne.s32.totalorder %s2845_s30, %s2393_s27  ;;  %p2402_p10 = scmp.lt.s32.totalorder %s2393_s27, %s2393_s27 }
  0x6a   : > { %p2396_p7 = pnand %p2394_p5, %p2855_p8  ;;  %p2403_p11 = por %p2402_p10, %p2401_p4 }
  0x6c   : > { %p2397_p9 = pneg %p2396_p7 }
  0x6e   : > { %p2404_p12 = pnand %p2403_p11, %p2397_p9 }
  0x70   : > { %2407 = shalt.err (!%p2404_p12)
}
  0x71   : > { %2218 = dma.hbm_to_vmem [thread:$0]  (!%p2839_p6), %s3460_s11, 512, %s2845_s30, [#allocation15], %s3421_s15, %s3421_s15, %s3423_s13  }
  0x72   : > { %s1934_s7 = sadd.s32 4294967294, %s2702_s21   ;;  %s2933_s9 = sadd.s32 1, %s2702_s21  }
  0x73   : > { %3461 = sst [smem:[#allocation30_spill]] %s2933_s9  ;;  %s50_s10 = sadd.s32 1, %s2698_s20 }
  0x74   : > { %s47_s16 = ssub.s32 %s2702_s21, %s2933_s9  ;;  %p57_p13 = scmp.ne.s32.totalorder %s2698_s20, %s2694_s19 }
  0x75   : > { %p48_p0 = scmp.eq.s32.totalorder %s47_s16, 0  ;;  %p58_p2 = scmp.eq.s32.totalorder %s2702_s21, 0 }
  0x76   : > { %p63_p5 = scmp.ne.s32.totalorder %s2694_s19, %s2690_s18  ;;  %p375_p7 = scmp.eq.s32.totalorder %s2823_s24, 1 }
  0x77   : > { %s2945_s17 = scalar_select %p48_p0, %s2698_s20, %s50_s10  }
  0x78   : > { %p59_p9 = por %p58_p2, %p57_p13  ;;  %p2949_p4 = por %p3428_p1, %p63_p5 }
  0x79   : > { %3462 = sst [smem:[#allocation31_spill]] %s2945_s17  ;;  %p2953_p10 = por %p375_p7, %p57_p13 }
  0x7a   : > { %s3463_s30 = scalar_select %p2949_p4, 1, 0 }
  0x7b   : > { %s3464_s22 = scalar_select %p2953_p10, 1, 0 }
  0x7c   : > { %p381_p11 = scmp.eq.s32.totalorder %s1934_s7, 1  ;;  %p2247_p12 = scmp.lt.s32.totalorder %s2702_s21, 2 }
  0x7d   : > { %3465 = sst [smem:[#allocation32_spill]] %s3464_s22  ;;  %s2959_s29 = sand.u32 1, %s2698_s20  }
  0x7e   : > { %p2961_p3 = por %p381_p11, %p63_p5  ;;  %s2966_s27 = sshll.u32 %s2959_s29, 3 }
  0x7f   : > { %s2969_s23 = sshll.u32 %s2702_s21, 7  ;;  %p2971_p0 = pnand %p2247_p12, %p59_p9 }
  0x80   : > { %s3466_s14 = scalar_select %p2961_p3, 1, 0 }
  0x81   : > { %s3468_s5 = scalar_select %p2971_p0, 1, 0 }
  0x82   : > { %3467 = sst [smem:[#allocation33_spill]] %s3466_s14  ;;  %s3430_s7 = sand.u32 1, %s2702_s21  }
  0x83   : > { %s3469_s1 = sld [smem:[#allocation34_spill]]  ;;  %s529_s13 = scalar_lea.vmem [#allocation5], %s2966_s27 }
  0x84   : > { %s536_s4 = sshll.u32 %s529_s13, 4  ;;  %s2987_s6 = scalar_lea.sflag [#allocation6], %s3430_s7  ;;  %s2983_s4 = int_to_ptr.vmem [resolvable:$true] %s536_s4 }
  0x85   : > { %p2993_p2 = pneg %p2971_p0 }
  0x89   : > { %s2980_s15 = scalar_lea.hbm %s3469_s1, %s2969_s23  ;;  %s2413_s13 = scalar_lea.hbm %s3469_s1, 256 }
  0x8a   : > { %s2408_s11 = scalar_lea.hbm %s2980_s15, 128  ;;  %p2414_p9 = scmp.lt.u32.totalorder %s2980_s15, %s3469_s1 }
  0x8b   : > { %p2409_p13 = scmp.ne.s32.totalorder %s2980_s15, %s2408_s11  ;;  %p2415_p11 = scmp.lt.u32.totalorder %s2413_s13, %s2408_s11 }
  0x8c   : > { %p2417_p1 = scmp.lt.u32.totalorder %s2408_s11, %s2980_s15 }
  0x8d   : > { %p2411_p5 = pnand %p2993_p2, %p2409_p13  ;;  %p2416_p12 = por %p2415_p11, %p2414_p9 }
  0x8f   : > { %p2412_p7 = pneg %p2411_p5  ;;  %p2418_p3 = por %p2417_p1, %p2416_p12 }
  0x91   : > { %p2419_p10 = pnand %p2418_p3, %p2412_p7 }
  0x93   : > { %2422 = shalt.err (!%p2419_p10)
}
  0x94   : > { %s2423_s7 = scalar_lea.vmem %s2983_s4, 128  ;;  %s2709_s10 = smov [#allocation5]  }
  0x95   : > { %p2424_p13 = scmp.ne.s32.totalorder %s2983_s4, %s2423_s7  ;;  %s2428_s16 = sshll.u32 %s2709_s10, 4  ;;  %s2429_s16 = int_to_ptr.vmem [resolvable:$false] %s2428_s16 }
  0x96   : > { %s2430_s20 = scalar_lea.vmem %s2429_s16, 256  ;;  %p2431_p6 = scmp.lt.s32.totalorder %s2983_s4, %s2429_s16 }
  0x97   : > { %p2426_p5 = pnand %p2424_p13, %p2993_p2  ;;  %p2432_p8 = scmp.lt.s32.totalorder %s2430_s20, %s2423_s7 }
  0x99   : > { %p2427_p4 = pneg %p2426_p5  ;;  %p2433_p9 = por %p2432_p8, %p2431_p6 }
  0x9b   : > { %p2434_p11 = pnand %p2433_p9, %p2427_p4 }
  0x9d   : > { %2437 = shalt.err (!%p2434_p11)
}
  0x9e   : > { %2228 = dma.hbm_to_vmem [thread:$0]  (!%p2971_p0), %s2980_s15, 128, %s2983_s4, %s2987_s6  }
  0x9f   : > { %s2710_s11 = smov [#allocation13]   ;;  %s2711_s13 = smov [#allocation16]  }
  0xa0   : > { %s458_s9 = sshll.u32 %s2710_s11, 4  ;;  %s490_s1 = sshll.u32 %s2711_s13, 4  ;;  %s459_s9 = int_to_ptr.vmem [resolvable:$true] %s458_s9  ;;  %s3017_s1 = int_to_ptr.vmem [resolvable:$true] %s490_s1 }
  0xa1   : > { %s2438_s7 = scalar_lea.hbm %s3409_s8, 512  ;;  %p3471_p3 = scmp.ne.s32.totalorder %s3458_s26, 0 }
  0xa2   : > { %p2439_p1 = scmp.ne.s32.totalorder %s3409_s8, %s2438_s7  ;;  %p2445_p4 = scmp.lt.u32.totalorder %s2438_s7, %s3409_s8 }
  0xa4   : > { %p2441_p6 = pnand %p2439_p1, %p3471_p3 }
  0xa6   : > { %p2442_p8 = pneg %p2441_p6 }
  0xa8   : > { %p2447_p10 = pnand %p2445_p4, %p2442_p8 }
  0xaa   : > { %2450 = shalt.err (!%p2447_p10)
}
  0xab   : > { %s2451_s15 = scalar_lea.vmem %s459_s9, 512  ;;  %p2459_p5 = scmp.lt.s32.totalorder %s459_s9, %s459_s9 }
  0xac   : > { %p2452_p7 = scmp.ne.s32.totalorder %s459_s9, %s2451_s15  ;;  %p2460_p9 = scmp.lt.s32.totalorder %s2451_s15, %s2451_s15 }
  0xae   : > { %p2454_p12 = pnand %p2452_p7, %p3471_p3  ;;  %p2461_p11 = por %p2460_p9, %p2459_p5 }
  0xb0   : > { %p2455_p13 = pneg %p2454_p12 }
  0xb2   : > { %p2462_p0 = pnand %p2461_p11, %p2455_p13 }
  0xb4   : > { %2465 = shalt.err (!%p2462_p0)
}
  0xb5   : > { %p3472_p1 = scmp.ne.s32.totalorder %s3456_s28, 0  ;;  %s3473_s14 = smov 8  }
  0xb6   : > { %s3474_s11 = smov 128   ;;  %s2466_s7 = scalar_lea.hbm %s3413_s12, 512 }
  0xb7   : > { %2215 = dma.hbm_to_vmem [thread:$0]  (!%p3472_p1), %s3409_s8, 512, %s459_s9, [#allocation12], %s3474_s11, %s3474_s11, %s3473_s14  }
  0xb8   : > { %p2467_p6 = scmp.ne.s32.totalorder %s3413_s12, %s2466_s7  ;;  %p2473_p4 = scmp.lt.u32.totalorder %s2466_s7, %s3413_s12 }
  0xba   : > { %p2469_p0 = pnand %p2467_p6, %p3471_p3 }
  0xbc   : > { %p2470_p8 = pneg %p2469_p0 }
  0xbe   : > { %p2475_p10 = pnand %p2473_p4, %p2470_p8 }
  0xc0   : > { %2478 = shalt.err (!%p2475_p10)
}
  0xc1   : > { %s2479_s9 = scalar_lea.vmem %s3017_s1, 512  ;;  %p2487_p5 = scmp.lt.s32.totalorder %s3017_s1, %s3017_s1 }
  0xc2   : > { %p2480_p7 = scmp.ne.s32.totalorder %s3017_s1, %s2479_s9  ;;  %p2488_p9 = scmp.lt.s32.totalorder %s2479_s9, %s2479_s9 }
  0xc4   : > { %p2482_p12 = pnand %p2480_p7, %p3471_p3  ;;  %p2489_p11 = por %p2488_p9, %p2487_p5 }
  0xc6   : > { %p2483_p13 = pneg %p2482_p12 }
  0xc8   : > { %p2490_p6 = pnand %p2489_p11, %p2483_p13 }
  0xca   : > { %2493 = shalt.err (!%p2490_p6)
}
  0xcb   : > { %2221 = dma.hbm_to_vmem [thread:$0]  (!%p3472_p1), %s3413_s12, 512, %s3017_s1, [#allocation15], %s3474_s11, %s3474_s11, %s3473_s14  }
  0xcc   : > { %s3070_s10 = scalar_lea.hbm %s3401_s0, %s2969_s23  ;;  %s511_s28 = scalar_lea.vmem [#allocation2], %s2966_s27 }
  0xcd   : > { %s518_s16 = sshll.u32 %s511_s28, 4  ;;  %s1946_s7 = sshll.u32 %s2959_s29, 2  ;;  %s3073_s16 = int_to_ptr.vmem [resolvable:$true] %s518_s16 }
  0xce   : > { %s508_s20 = scalar_lea.sflag [#allocation3], %s2959_s29  ;;  %s2494_s4 = scalar_lea.hbm %s3070_s10, 128 }
  0xcf   : > { %p2495_p3 = scmp.ne.s32.totalorder %s3070_s10, %s2494_s4  ;;  %s2499_s11 = scalar_lea.hbm %s3401_s0, 256 }
  0xd0   : > { %p2500_p8 = scmp.lt.u32.totalorder %s3070_s10, %s3401_s0  ;;  %p2501_p4 = scmp.lt.u32.totalorder %s2499_s11, %s2494_s4 }
  0xd1   : > { %p2497_p0 = pnand %p2495_p3, %p2993_p2  ;;  %p2503_p7 = scmp.lt.u32.totalorder %s2494_s4, %s3070_s10 }
  0xd2   : > { %p2502_p10 = por %p2501_p4, %p2500_p8 }
  0xd3   : > { %p2498_p1 = pneg %p2497_p0 }
  0xd4   : > { %p2504_p12 = por %p2503_p7, %p2502_p10 }
  0xd6   : > { %p2505_p13 = pnand %p2504_p12, %p2498_p1 }
  0xd8   : > { %2508 = shalt.err (!%p2505_p13)
}
  0xd9   : > { %s2509_s22 = scalar_lea.vmem %s3073_s16, 128  ;;  %s2712_s18 = smov [#allocation2]  }
  0xda   : > { %p2510_p5 = scmp.ne.s32.totalorder %s3073_s16, %s2509_s22  ;;  %s2514_s26 = sshll.u32 %s2712_s18, 4  ;;  %s2515_s26 = int_to_ptr.vmem [resolvable:$false] %s2514_s26 }
  0xdb   : > { %s2516_s13 = scalar_lea.vmem %s2515_s26, 256  ;;  %p2517_p6 = scmp.lt.s32.totalorder %s3073_s16, %s2515_s26 }
  0xdc   : > { %p2512_p9 = pnand %p2510_p5, %p2993_p2  ;;  %p2518_p3 = scmp.lt.s32.totalorder %s2516_s13, %s2509_s22 }
  0xde   : > { %p2513_p11 = pneg %p2512_p9  ;;  %p2519_p0 = por %p2518_p3, %p2517_p6 }
  0xe0   : > { %p2520_p8 = pnand %p2519_p0, %p2513_p11 }
  0xe2   : > { %2523 = shalt.err (!%p2520_p8)
}
  0xe3   : > { %p3475_p1 = scmp.ne.s32.totalorder %s3468_s5, 0  ;;  %s1947_s28 = sshll.u32 %s2702_s21, 6 }
  0xe4   : > { %s3102_s14 = scalar_lea.hbm %s3403_s2, %s1947_s28  ;;  %s547_s11 = scalar_lea.vmem [#allocation7], %s1946_s7 }
  0xe5   : > { %2225 = dma.hbm_to_vmem [thread:$0]  (!%p3475_p1), %s3070_s10, 128, %s3073_s16, %s508_s20  }
  0xe6   : > { %s554_s15 = sshll.u32 %s547_s11, 4  ;;  %s2524_s9 = scalar_lea.hbm %s3102_s14, 64  ;;  %s555_s15 = int_to_ptr.vmem [resolvable:$true] %s554_s15 }
  0xe7   : > { %p2525_p4 = scmp.ne.s32.totalorder %s3102_s14, %s2524_s9  ;;  %s2529_s20 = scalar_lea.hbm %s3403_s2, 128 }
  0xe8   : > { %p2530_p12 = scmp.lt.u32.totalorder %s3102_s14, %s3403_s2  ;;  %p2531_p13 = scmp.lt.u32.totalorder %s2529_s20, %s2524_s9 }
  0xe9   : > { %p2527_p10 = pnand %p2525_p4, %p2993_p2  ;;  %p2533_p9 = scmp.lt.u32.totalorder %s2524_s9, %s3102_s14 }
  0xea   : > { %p2532_p5 = por %p2531_p13, %p2530_p12 }
  0xeb   : > { %p2528_p7 = pneg %p2527_p10 }
  0xec   : > { %p2534_p11 = por %p2533_p9, %p2532_p5 }
  0xee   : > { %p2535_p6 = pnand %p2534_p11, %p2528_p7 }
  0xf0   : > { %2538 = shalt.err (!%p2535_p6)
}
  0xf1   : > { %s2539_s29 = scalar_lea.vmem %s555_s15, 64  ;;  %s2713_s7 = smov [#allocation7]  }
  0xf2   : > { %p2540_p3 = scmp.ne.s32.totalorder %s555_s15, %s2539_s29  ;;  %s2544_s26 = sshll.u32 %s2713_s7, 4  ;;  %s2545_s26 = int_to_ptr.vmem [resolvable:$false] %s2544_s26 }
  0xf3   : > { %s2546_s13 = scalar_lea.vmem %s2545_s26, 128  ;;  %p2547_p4 = scmp.lt.s32.totalorder %s555_s15, %s2545_s26 }
  0xf4   : > { %p2542_p0 = pnand %p2540_p3, %p2993_p2  ;;  %p2548_p10 = scmp.lt.s32.totalorder %s2546_s13, %s2539_s29 }
  0xf6   : > { %p2543_p8 = pneg %p2542_p0  ;;  %p2549_p1 = por %p2548_p10, %p2547_p4 }
  0xf8   : > { %p2550_p12 = pnand %p2549_p1, %p2543_p8 }
  0xfa   : > { %2553 = shalt.err (!%p2550_p12)
}
  0xfb   : > { %p3476_p13 = scmp.ne.s32.totalorder %s3468_s5, 0  ;;  %s3128_s1 = scalar_lea.hbm %s3404_s3, %s2969_s23 }
  0xfc   : > { %s565_s11 = scalar_lea.vmem [#allocation8], %s2966_s27  ;;  %s3477_s10 = sand.u32 1, %s2702_s21  }
  0xfd   : > { %2231 = dma.hbm_to_vmem [thread:$0]  (!%p3476_p13), %s3102_s14, 64, %s555_s15, %s2987_s6  }
  0xfe   : > { %s572_s9 = sshll.u32 %s565_s11, 4  ;;  %s562_s16 = scalar_lea.sflag [#allocation9], %s3477_s10  ;;  %s573_s9 = int_to_ptr.vmem [resolvable:$true] %s572_s9 }
  0xff   : > { %s2554_s20 = scalar_lea.hbm %s3128_s1, 128  ;;  %s2559_s15 = scalar_lea.hbm %s3404_s3, 256 }
 0x100   : > { %p2555_p1 = scmp.ne.s32.totalorder %s3128_s1, %s2554_s20  ;;  %p2560_p9 = scmp.lt.u32.totalorder %s3128_s1, %s3404_s3 }
 0x101   : > { %p2561_p11 = scmp.lt.u32.totalorder %s2559_s15, %s2554_s20  ;;  %p2563_p3 = scmp.lt.u32.totalorder %s2554_s20, %s3128_s1 }
 0x102   : > { %p2557_p7 = pnand %p2555_p1, %p2993_p2 }
 0x103   : > { %p2562_p6 = por %p2561_p11, %p2560_p9 }
 0x104   : > { %p2558_p5 = pneg %p2557_p7 }
 0x105   : > { %p2564_p0 = por %p2563_p3, %p2562_p6 }
 0x107   : > { %p2565_p8 = pnand %p2564_p0, %p2558_p5 }
 0x109   : > { %2568 = shalt.err (!%p2565_p8)
}
 0x10a   : > { %s2569_s27 = scalar_lea.vmem %s573_s9, 128  ;;  %s2714_s18 = smov [#allocation8]  }
 0x10b   : > { %p2570_p4 = scmp.ne.s32.totalorder %s573_s9, %s2569_s27  ;;  %s2574_s29 = sshll.u32 %s2714_s18, 4  ;;  %s2575_s29 = int_to_ptr.vmem [resolvable:$false] %s2574_s29 }
 0x10c   : > { %s2576_s7 = scalar_lea.vmem %s2575_s29, 256  ;;  %p2577_p1 = scmp.lt.s32.totalorder %s573_s9, %s2575_s29 }
 0x10d   : > { %p2572_p10 = pnand %p2570_p4, %p2993_p2  ;;  %p2578_p7 = scmp.lt.s32.totalorder %s2576_s7, %s2569_s27 }
 0x10f   : > { %p2573_p12 = pneg %p2572_p10  ;;  %p2579_p13 = por %p2578_p7, %p2577_p1 }
 0x111   : > { %p2580_p9 = pnand %p2579_p13, %p2573_p12 }
 0x113   : > { %2583 = shalt.err (!%p2580_p9)
}
 0x114   : > { %p3478_p11 = scmp.ne.s32.totalorder %s3468_s5, 0  ;;  %p3479_p5 = scmp.ne.s32.totalorder %s3455_s25, 0 }
 0x115   : > { %s3153_s17 = sand.u32 (!%p3479_p5), 1, %s2694_s19   ;;  %p3480_p2 = scmp.ne.s32.totalorder (!%p3479_p5), %s3463_s30, 0 }
 0x116   : > { %2234 = dma.hbm_to_vmem [thread:$0]  (!%p3478_p11), %s3128_s1, 128, %s573_s9, %s562_s16  }
 0x117   : > { %581 = sbr.rel (%p3479_p5) target bundleno = 3568 (0xdf0), region = 76  ;;  %s3156_s26 = sshll.u32 (!%p3479_p5), %s3153_s17, 3 }
 0x118   : > { %s584_s13 = scalar_lea.sflag (!%p3479_p5), [#allocation3], %s3153_s17  ;;  %s587_s28 = scalar_lea.vmem (!%p3479_p5), [#allocation2], %s3156_s26 }
 0x11e   : > { %2657 = dma.done.wait (%p3480_p2), %s584_s13, 128  }
 0x11f   : > { %2659 = vsyncadd (%p3480_p2), %s584_s13, 4294967168  ;;  %s592_s25 = sand.u32 1, %s2823_s24   ;;  %s596_s4 = scalar_lea.vmem [#allocation5], %s3156_s26 }
 0x120   : > { %s593_s5 = scalar_lea.sflag [#allocation6], %s592_s25 }
 0x121   : > { %2661 = dma.done.wait (%p3480_p2), %s593_s5, 192  }
 0x122   : > { %2663 = vsyncadd (%p3480_p2), %s593_s5, 4294967104  ;;  %s1953_s1 = sshll.u32 %s3153_s17, 2  ;;  %s611_s9 = scalar_lea.sflag [#allocation9], %s592_s25 }
 0x123   : > { %s3173_s11 = scalar_lea.vmem [#allocation7], %s1953_s1  ;;  %s614_s10 = scalar_lea.vmem [#allocation8], %s3156_s26 }
 0x124   : > { %2665 = dma.done.wait (%p3480_p2), %s611_s9, 128  }
 0x125   : > { %2667 = vsyncadd (%p3480_p2), %s611_s9, 4294967168  ;;  %p3481_p13 = scmp.eq.s32.totalorder %s2823_s24, 0 }
 0x127   : > { %2669 = dma.done.wait (%p3481_p13), [#allocation9], 256   ;;  %p3482_p6 = pmov %p3481_p13 }
 0x129   : > { %2671 = vsyncadd (%p3482_p6), [#allocation9], 4294967040  ;;  %p3483_p3 = pmov %p3482_p6 }
 0x12b   : > { %2673 = dma.done.wait (%p3483_p3), [#allocation12], 1024   ;;  %p3484_p0 = pmov %p3483_p3 }
 0x12d   : > { %2675 = vsyncadd (%p3484_p0), [#allocation12], 4294966272  ;;  %p3485_p8 = pmov %p3484_p0 }
 0x12e   : > { %p3486_p4 = pmov %p3484_p0 }
 0x12f   : > { %2677 = dma.done.wait (%p3485_p8), [#allocation15], 1024  }
 0x130   : > { %2679 = vsyncadd (%p3486_p4), [#allocation15], 4294966272  ;;  %v2715_v0 = vmov 0.0|0.0   ;;  %vm2716_vm0 = vmmov 0   ;;  %v2717_v1 = vmov 0.0   ;;  %v704_v2 = vld [vmem:[#allocation10] sm:$0xff]  ;;  %v1036_v44 = vlaneseq }
 0x131   : > { %2129 = vmatprep.subr.bf16.mxu0 %v2715_v0  ;;  %2034 = vmatprep.mubr.msk.f32.mxu0 %vm2716_vm0, %v2717_v1  ;;  %v705_v3 = vld [vmem:[#allocation10 + $0x8] sm:$0xff]  ;;  %v788_v5 = vld [vmem:[#allocation11] sm:$0xff]  ;;  %v789_v6 = vld [vmem:[#allocation11 + $0x8] sm:$0xff]  ;;  %vm713_vm1 = vcmask 130048   ;;  %s3487_s20 = sld [smem:[#allocation39_spill]]  ;;  %s3489_s27 = sld [smem:[#allocation36_spill]] }
 0x132   : > { %2132 = vmatprep.subr.bf16.mxu1 %v2715_v0  ;;  %2045 = vmatprep.mubr.msk.f32.mxu1 %vm2716_vm0, %v2717_v1  ;;  %v2130_v4 = vpack.c.bf16 %v705_v3, %v704_v2  ;;  %v2133_v7 = vpack.c.bf16 %v789_v6, %v788_v5  ;;  %v701_v8 = vld [vmem:[%s587_s28] sm:$0xff]  ;;  %v790_v9 = vld [vmem:[#allocation11 + $0x10] sm:$0xff]  ;;  %v875_v17 = vld [vmem:[#allocation13 + $0x8] sm:$0xff]  ;;  %vm799_vm2 = vcmask 261120   ;;  %s3490_s5 = sld [smem:[#allocation38_spill]]  ;;  %s3491_s30 = sld [smem:[#allocation40_spill]] }
 0x133   : > { %v791_v10 = vld [vmem:[#allocation11 + $0x18] sm:$0xff]  ;;  %v874_v16 = vld [vmem:[#allocation13] sm:$0xff]  ;;  %v876_v26 = vld [vmem:[#allocation13 + $0x10] sm:$0xff]  ;;  %v1037_v46 = vand.u32 127, %v1036_v44  ;;  %vm1066_vm3 = vcmask 64512   ;;  %s2718_s16 = smov 64  }
 0x134   : > { %2131 = vmatpush3.bf16.msra.mxu0 %v2130_v4  ;;  %2134 = vmatpush3.bf16.msra.mxu1 %v2133_v7  ;;  %v2136_v11 = vpack.c.bf16 %v791_v10, %v790_v9  ;;  %v2145_v21 = vpack.c.bf16 %v875_v17, %v874_v16  ;;  %v877_v27 = vld [vmem:[#allocation13 + $0x18] sm:$0xff]  ;;  %v703_v29 = vld [vmem:[%s614_s10] sm:$0xff]  ;;  %v3243_v47 = vld [vmem:[%s596_s4] sm:$0xff]  ;;  %s2719_s4 = smov 32   ;;  %s3494_s15 = sld [smem:[#allocation42_spill]]  ;;  %vm1685_vm7 = vcmask 523264  }
 0x135   : > { %2138 = vmatprep.subr.bf16.mxu0 %v2715_v0  ;;  %2135 = vmatprep.subr.bf16.mxu1 %v2715_v0  ;;  %v2148_v28 = vpack.c.bf16 %v877_v27, %v876_v26  ;;  %v1067_v48 = vsel %vm1066_vm3, %v3243_v47, 0.0  ;;  %vm1038_vm4 = vcmp.ge.s32.totalorder %v1037_v46, 64  ;;  %vm1039_vm5 = vcmp.lt.s32.totalorder %v1037_v46, 96  ;;  %v1159_v3 = vld [vmem:[#allocation14] sm:$0xff]  ;;  %v1160_v4 = vld [vmem:[#allocation14 + $0x8] sm:$0xff]  ;;  %s3495_s23 = sld [smem:[#allocation32_spill]] }
 0x136   : > { %1068 = vadd.xlane.f32.xlu1 %v1067_v48  ;;  %vm3247_vm6 = vmand %vm1038_vm4, %vm1039_vm5  ;;  %v3262_v5 = vpack.c.bf16 %v1160_v4, %v1159_v3  ;;  %v1163_v9 = vld [vmem:[#allocation16] sm:$0xff]  ;;  %v1164_v10 = vld [vmem:[#allocation16 + $0x8] sm:$0xff]  ;;  %s700_s22 = scalar_lea.vmem [#allocation18], %s3156_s26  ;;  %s3496_s13 = sld [smem:[#allocation44_spill]] }
 0x137   : > { %2035 = vmatmul.mubr.msk.f32.vlgmr.msra.gmra.mrb[0].mxu0 %vm713_vm1, %v701_v8  ;;  %s3488_s6 = smov %s3487_s20  ;;  %v878_v12 = vld [vmem:[%s3487_s20] sm:$0xff]  ;;  %s1719_s18 = sshll.u32 %s700_s22, 4  ;;  %s1720_s18 = int_to_ptr.vmem [resolvable:$true] %s1719_s18 }
 0x138   : > { %2056 = vmatprep.mubr.msk.f32.mxu0 %vm2716_vm0, %v2717_v1  ;;  %2137 = vmatpush3.bf16.msra.mxu1 %v2136_v11  ;;  %v879_v13 = vld [vmem:[%s3488_s6 + $0x8] sm:$0xff]  ;;  %v1962_v15 = vld [vmem:[%s3489_s27] ss:$0 sm:$0xff]  ;;  %v880_v23 = vld [vmem:[%s3488_s6 + $0x10] sm:$0xff]  ;;  %v2151_v11 = vpack.c.bf16 %v1164_v10, %v1163_v9  ;;  %s1983_s27 = sshll.u32 %s2823_s24, 7  ;;  %s1693_s25 = scalar_lea.sflag [#allocation19], %s3153_s17 }
 0x139   : > { %2144 = vmatprep.subr.bf16.mxu1 %v2715_v0  ;;  %v2139_v14 = vpack.c.bf16 %v879_v13, %v878_v12  ;;  %v881_v24 = vld [vmem:[%s3488_s6 + $0x18] sm:$0xff]  ;;  %v1964_v30 = vld [vmem:[%s3490_s5] ss:$0 sm:$0xff]  ;;  %s2584_s5 = scalar_lea.vmem %s1720_s18, 128 }
 0x13a   : > { %v2142_v25 = vpack.c.bf16 %v881_v24, %v880_v23  ;;  %v1968_v38 = vld [vmem:[%s3491_s30] ss:$0 sm:$0xff]  ;;  %v1165_v13 = vld [vmem:[#allocation16 + $0x10] sm:$0xff]  ;;  %p2585_p10 = scmp.ne.s32.totalorder %s1720_s18, %s2584_s5 }
 0x13b   : > { %2140 = vmatpush3.bf16.msra.mxu0 %v2139_v14  ;;  %v1166_v14 = vld [vmem:[#allocation16 + $0x18] sm:$0xff]  ;;  %p3497_p12 = scmp.ne.s32.totalorder %s3495_s23, 0 }
 0x13c   : > { %2141 = vmatprep.subr.bf16.mxu0 %v2715_v0  ;;  %v1604_v49 = vld [vmem:[%s3173_s11] sm:$0xf]  ;;  %s3331_s28 = scalar_lea.hbm %s3496_s13, %s1983_s27  ;;  %s2720_s11 = smov [#allocation18]  }
 0x13d   : > { %p2586_p1 = pnand %p2585_p10, %p3497_p12  ;;  %s2588_s9 = sshll.u32 %s2720_s11, 4  ;;  %s2589_s9 = int_to_ptr.vmem [resolvable:$false] %s2588_s9 }
 0x13e   : > { %s2590_s10 = scalar_lea.vmem %s2589_s9, 256  ;;  %p2591_p9 = scmp.lt.s32.totalorder %s1720_s18, %s2589_s9 }
 0x13f   : > { %2143 = vmatpush3.bf16.msra.mxu0 %v2142_v25  ;;  %p2587_p7 = pneg %p2586_p1  ;;  %p2592_p11 = scmp.lt.s32.totalorder %s2590_s10, %s2584_s5 }
 0x140   : > { %2070 = vmatprep.subr.mxu0 %v2717_v1 }
 0x141   : > { %p2593_p5 = por %p2592_p11, %p2591_p9 }
 0x142   : > { %2057 = vmatmul.mubr.msk.f32.vlgmr.msra.gmra.mrb[2].mxu0 %vm799_vm2, %v703_v29 }
 0x143   : > { %2072 = vmatprep.mubr.msk.f32.mxu0 %vm2716_vm0, %v2717_v1  ;;  %p2594_p2 = pnand %p2593_p5, %p2587_p7 }
 0x1c3   : > { %v1069_v59 = vpop.xlane.xlu1 %1068 }
 0x1c4   : > { %v1070_v60 = vadd.f32 2.0, %v1069_v59 }
 0x20a   : > { %v783_v18 = vpop.f32.mrb[0].mxu0 }
 0x20b   : > { %v784_v19 = vadd.f32 %v1962_v15, %v783_v18  ;;  %v2036_v20 = vpop.f32.mrb[1].mxu0  ;;  %v2154_v15 = vpack.c.bf16 %v1166_v14, %v1165_v13  ;;  %v1161_v18 = vld [vmem:[#allocation14 + $0x10] sm:$0xff] }
 0x20d   : > { %v787_v22 = vmax.f32 %v784_v19, 0.0  ;;  %v1162_v19 = vld [vmem:[#allocation14 + $0x18] sm:$0xff] }
 0x20e   : > { %v2160_v20 = vpack.c.bf16 %v1162_v19, %v1161_v18 }
 0x20f   : > { %2046 = vmatmul.mubr.msk.f32.vlgmr.msra.gmra.mrb[0].mxu1 %vm799_vm2, %v787_v22 }
 0x210   : > { %2146 = vmatpush3.bf16.msra.mxu1 %v2145_v21  ;;  %2067 = vmatprep.mubr.msk.f32.mxu1 %vm2716_vm0, %v2717_v1 }
 0x211   : > { %2147 = vmatprep.subr.bf16.mxu1 %v2715_v0 }
 0x214   : > { %2149 = vmatpush3.bf16.msra.mxu1 %v2148_v28  ;;  %v1973_v28 = vld [vmem:[%s3494_s15] ss:$0 sm:$0xff] }
 0x215   : > { %2156 = vmatprep.subr.bf16.mxu1 %v2715_v0  ;;  %v951_v35 = vpop.f32.mrb[2].mxu0 }
 0x216   : > { %v2058_v36 = vpop.f32.mrb[3].mxu0 }
 0x2e2   : > { %v869_v31 = vpop.f32.mrb[0].mxu1 }
 0x2e3   : > { %v870_v32 = vadd.f32 %v1964_v30, %v869_v31  ;;  %v2047_v33 = vpop.f32.mrb[1].mxu1 }
 0x2e5   : > { %v873_v34 = vmax.f32 %v870_v32, 0.0 }
 0x2e7   : > { %2068 = vmatmul.mubr.msk.f32.vlgmr.msra.gmra.mrb[2].mxu1 %vm799_vm2, %v873_v34 }
 0x2e8   : > { %2094 = vmatprep.mubr.msk.f32.mxu1 %vm2716_vm0, %v2717_v1  ;;  %2158 = vmatpush3.bf16.msra.mxu1 %v3262_v5 }
 0x2e9   : > { %2159 = vmatprep.subr.bf16.mxu1 %v2715_v0 }
 0x2ec   : > { %2161 = vmatpush3.bf16.msra.mxu1 %v2160_v20 }
 0x2ed   : > { %2162 = vmatprep.subr.bf16.mxu1 %v2715_v0 }
 0x3ba   : > { %v1024_v37 = vpop.f32.mrb[2].mxu1 }
 0x3bb   : > { %v1025_v39 = vadd.f32 %v1024_v37, %v951_v35  ;;  %v2069_v40 = vpop.f32.mrb[3].mxu1 }
 0x3bd   : > { %v1035_v41 = vadd.f32 %v1968_v38, %v1025_v39 }
 0x3bf   : > { %v1969_v42 = vmul.f32 -1.442695, %v1035_v41 }
 0x3c1   : > { %2298 = vpow2.f32 %v1969_v42 }
 0x3c2   : > { %2300 = vtanh.f32 %v1035_v41 }
 0x3cb   : > { %v2299_v43 = vpop.eup %2298 }
 0x3cc   : > { %v1045_v45 = vadd.f32 1.0, %v2299_v43  ;;  %v2301_v50 = vpop.eup %2300 }
 0x3ce   : > { %2302 = vrcp.f32 %v1045_v45 }
 0x3d8   : > { %v2303_v51 = vpop.eup %2302 }
 0x3d9   : > { %v1048_v52 = vsel %vm3247_vm6, %v2301_v50, %v2303_v51 }
 0x3da   : > { %1051 = vrot.lane.b32.xlu0 %v1048_v52, %s2718_s16  ;;  %v1049_v55 = vmul.f32 %v1048_v52, %v703_v29 }
 0x44c   : > { %v1052_v53 = vpop.permute.xlu0 %1051 }
 0x44d   : > { %v1054_v54 = vmul.f32 %v1052_v53, %v1048_v52 }
 0x44f   : > { %1056 = vrot.lane.b32.xlu0 %v1054_v54, %s2719_s4 }
 0x4c1   : > { %v1057_v56 = vpop.permute.xlu0 %1056 }
 0x4c2   : > { %v3255_v57 = vadd.f32 %v1057_v56, %v1049_v55 }
 0x4c4   : > { %2304 = vtanh.f32 %v3255_v57 }
 0x4c5   : > { %2306 = vrsqrt.f32 %v1070_v60 }
 0x4ce   : > { %v2305_v58 = vpop.eup %2304 }
 0x4cf   : > { %1062 = vrot.lane.b32.xlu1 %v2305_v58, %s2718_s16  ;;  %v3259_v61 = vpop.eup %2306 }
 0x4d0   : > { %v1072_v62 = vmul.f32 2.0, %v3259_v61 }
 0x4d2   : > { %v3266_v7 = vmul.f32 %v3259_v61, %v1072_v62 }
 0x541   : > { %v1063_v63 = vpop.permute.xlu1 %1062 }
 0x542   : > { %v1065_v2 = vmul.f32 %v1063_v63, %v1048_v52 }
 0x544   : > { %v1074_v6 = vmul.f32 %v3259_v61, %v1065_v2  ;;  %v1153_v8 = vmul.f32 %v3266_v7, %v1065_v2 }
 0x546   : > { %1076 = vrot.lane.b32.xlu0 %v1074_v6, %s2719_s4 }
 0x54a   : > { %1155 = vrot.lane.b32.xlu0 %v1153_v8, %s2719_s4 }
 0x54e   : > { %1168 = vrot.lane.b32.xlu0 %v1065_v2, %s2719_s4 }
 0x5b8   : > { %v1077_v12 = vpop.permute.xlu0 %1076 }
 0x5b9   : > { %2071 = vmatpush3.msra.mxu0 %v1077_v12 }
 0x5ba   : > { %2073 = vmatmul.mubr.msk.f32.vlgmr.msra.gmra.mrb[4].mxu0 %vm1066_vm3, %v3243_v47  ;;  %2150 = vmatprep.subr.bf16.mxu0 %v2715_v0 }
 0x5bb   : > { %2152 = vmatpush3.bf16.msra.mxu0 %v2151_v11  ;;  %2083 = vmatprep.mubr.msk.f32.mxu0 %vm2716_vm0, %v2717_v1 }
 0x5bc   : > { %v1156_v16 = vpop.permute.xlu0 %1155  ;;  %2153 = vmatprep.subr.bf16.mxu0 %v2715_v0 }
 0x5bf   : > { %2155 = vmatpush3.bf16.msra.mxu0 %v2154_v15 }
 0x5c0   : > { %v1169_v17 = vpop.permute.xlu0 %1168  ;;  %2097 = vmatprep.subr.mxu0 %v2717_v1 }
 0x5c2   : > { %2084 = vmatmul.mubr.msk.f32.vlgmr.msra.gmra.mrb[6].mxu0 %vm799_vm2, %v1169_v17 }
 0x5c3   : > { %2099 = vmatprep.mubr.msk.f32.mxu0 %vm2716_vm0, %v2717_v1 }
 0x68d   : > { %v1148_v21 = vpop.f32.mrb[4].mxu0 }
 0x68e   : > { %v1152_v22 = vmul.f32 %v3259_v61, %v1148_v21  ;;  %v2074_v23 = vpop.f32.mrb[5].mxu0 }
 0x690   : > { %v1158_v24 = vadd.f32 %v1156_v16, %v1152_v22 }
 0x692   : > { %2095 = vmatmul.mubr.msk.f32.vlgmr.msra.gmra.mrb[4].mxu1 %vm799_vm2, %v1158_v24 }
 0x693   : > { %2164 = vmatpush3.bf16.msra.mxu1 %v2151_v11  ;;  %2110 = vmatprep.mubr.msk.f32.mxu1 %vm2716_vm0, %v2717_v1 }
 0x694   : > { %2165 = vmatprep.subr.bf16.mxu1 %v2715_v0 }
 0x695   : > { %v1238_v25 = vpop.f32.mrb[6].mxu0 }
 0x696   : > { %v2085_v26 = vpop.f32.mrb[7].mxu0 }
 0x697   : > { %2167 = vmatpush3.bf16.msra.mxu1 %v2154_v15 }
 0x698   : > { %2124 = vmatprep.subr.mxu1 %v2717_v1 }
 0x765   : > { %v1311_v27 = vpop.f32.mrb[4].mxu1 }
 0x766   : > { %v1312_v29 = vadd.f32 %v1311_v27, %v1238_v25  ;;  %v2096_v30 = vpop.f32.mrb[5].mxu1 }
 0x768   : > { %v1322_v31 = vadd.f32 %v1973_v28, %v1312_v29 }
 0x76a   : > { %v1974_v32 = vmul.f32 -1.442695, %v1322_v31 }
 0x76c   : > { %2308 = vpow2.f32 %v1974_v32 }
 0x76d   : > { %2310 = vtanh.f32 %v1322_v31 }
 0x776   : > { %v2309_v33 = vpop.eup %2308 }
 0x777   : > { %v1327_v34 = vadd.f32 1.0, %v2309_v33  ;;  %v2311_v35 = vpop.eup %2310 }
 0x779   : > { %2312 = vrcp.f32 %v1327_v34 }
 0x783   : > { %v2313_v36 = vpop.eup %2312 }
 0x784   : > { %v1330_v37 = vsel %vm3247_vm6, %v2311_v35, %v2313_v36 }
 0x785   : > { %1333 = vrot.lane.b32.xlu0 %v1330_v37, %s2718_s16  ;;  %v1331_v40 = vmul.f32 %v1330_v37, %v3255_v57 }
 0x7f7   : > { %v1334_v38 = vpop.permute.xlu0 %1333 }
 0x7f8   : > { %v1336_v39 = vmul.f32 %v1334_v38, %v1330_v37 }
 0x7fa   : > { %1338 = vrot.lane.b32.xlu1 %v1336_v39, %s2719_s4 }
 0x86c   : > { %v1339_v41 = vpop.permute.xlu1 %1338 }
 0x86d   : > { %v1341_v42 = vadd.f32 %v1339_v41, %v1331_v40 }
 0x86f   : > { %2314 = vtanh.f32 %v1341_v42 }
 0x879   : > { %v2315_v43 = vpop.eup %2314 }
 0x87a   : > { %1344 = vrot.lane.b32.xlu0 %v2315_v43, %s2718_s16 }
 0x8ec   : > { %v1345_v44 = vpop.permute.xlu0 %1344 }
 0x8ed   : > { %v1347_v45 = vmul.f32 %v1345_v44, %v1330_v37 }
 0x8ef   : > { %v1424_v46 = vmul.f32 %v1347_v45, %v3266_v7  ;;  %v1348_v48 = vmul.f32 %v3259_v61, %v1347_v45 }
 0x8f1   : > { %1426 = vrot.lane.b32.xlu0 %v1424_v46, %s2719_s4  ;;  %1350 = vrot.lane.b32.xlu1 %v1348_v48, %s2719_s4 }
 0x8f5   : > { %1431 = vrot.lane.b32.xlu1 %v1347_v45, %s2719_s4 }
 0x963   : > { %v1351_v50 = vpop.permute.xlu1 %1350  ;;  %v1427_v54 = vpop.permute.xlu0 %1426 }
 0x964   : > { %2098 = vmatpush3.msra.mxu0 %v1351_v50 }
 0x965   : > { %2100 = vmatmul.mubr.msk.f32.vlgmr.msra.gmra.mrb[8].mxu0 %vm1066_vm3, %v3243_v47  ;;  %2168 = vmatprep.subr.bf16.mxu0 %v2715_v0 }
 0x966   : > { %2170 = vmatpush3.bf16.msra.mxu0 %v3262_v5  ;;  %2121 = vmatprep.mubr.msk.f32.mxu0 %vm2716_vm0, %v2717_v1 }
 0x967   : > { %v1432_v51 = vpop.permute.xlu1 %1431  ;;  %2171 = vmatprep.subr.bf16.mxu0 %v2715_v0 }
 0x968   : > { %2111 = vmatmul.mubr.msk.f32.vlgmr.msra.gmra.mrb[6].mxu1 %vm799_vm2, %v1432_v51 }
 0x969   : > { %2126 = vmatprep.mubr.msk.f32.mxu1 %vm2716_vm0, %v2717_v1 }
 0x96a   : > { %2173 = vmatpush3.bf16.msra.mxu0 %v2160_v20 }
 0xa38   : > { %v1419_v52 = vpop.f32.mrb[8].mxu0 }
 0xa39   : > { %v1423_v53 = vmul.f32 %v3259_v61, %v1419_v52  ;;  %v2101_v47 = vpop.f32.mrb[9].mxu0 }
 0xa3b   : > { %v1429_v55 = vadd.f32 %v1427_v54, %v1423_v53  ;;  %v1501_v56 = vpop.f32.mrb[6].mxu1 }
 0xa3c   : > { %v2112_v57 = vpop.f32.mrb[7].mxu1 }
 0xa3d   : > { %2122 = vmatmul.mubr.msk.f32.vlgmr.msra.gmra.mrb[10].mxu0 %vm799_vm2, %v1429_v55 }
 0xb10   : > { %v1574_v58 = vpop.f32.mrb[10].mxu0 }
 0xb11   : > { %v1575_v59 = vadd.f32 %v1574_v58, %v1501_v56  ;;  %v2123_v60 = vpop.f32.mrb[11].mxu0 }
 0xb13   : > { %v1578_v0 = vadd.f32 %v1973_v28, %v1575_v59 }
 0xb15   : > { %v1978_v62 = vmul.f32 -1.442695, %v1578_v0 }
 0xb17   : > { %2316 = vpow2.f32 %v1978_v62 }
 0xb18   : > { %2318 = vtanh.f32 %v1578_v0 }
 0xb21   : > { %v2317_v63 = vpop.eup %2316 }
 0xb22   : > { %v1583_v2 = vadd.f32 1.0, %v2317_v63  ;;  %v2319_v1 = vpop.eup %2318 }
 0xb24   : > { %2320 = vrcp.f32 %v1583_v2 }
 0xb2e   : > { %v2321_v61 = vpop.eup %2320 }
 0xb2f   : > { %v1586_v3 = vsel %vm3247_vm6, %v2319_v1, %v2321_v61 }
 0xb30   : > { %1589 = vrot.lane.b32.xlu0 %v1586_v3, %s2718_s16  ;;  %v1587_v6 = vmul.f32 %v1586_v3, %v1341_v42 }
 0xba2   : > { %v1590_v4 = vpop.permute.xlu0 %1589 }
 0xba3   : > { %v1592_v5 = vmul.f32 %v1590_v4, %v1586_v3 }
 0xba5   : > { %1594 = vrot.lane.b32.xlu1 %v1592_v5, %s2719_s4 }
 0xc17   : > { %v1595_v7 = vpop.permute.xlu1 %1594 }
 0xc18   : > { %v1597_v8 = vadd.f32 %v1595_v7, %v1587_v6 }
 0xc1a   : > { %2322 = vtanh.f32 %v1597_v8 }
 0xc24   : > { %v2323_v9 = vpop.eup %2322 }
 0xc25   : > { %1600 = vrot.lane.b32.xlu0 %v2323_v9, %s2718_s16 }
 0xc97   : > { %v1601_v10 = vpop.permute.xlu0 %1600 }
 0xc98   : > { %v1603_v11 = vmul.f32 %v1601_v10, %v1586_v3 }
 0xc9a   : > { %1606 = vrot.lane.b32.xlu1 %v1603_v11, %s2719_s4 }
 0xd0c   : > { %v1607_v12 = vpop.permute.xlu1 %1606 }
 0xd0d   : > { %v1684_v13 = vsel %vm799_vm2, %v1607_v12, %v1597_v8  ;;  %2125 = vmatpush3.msra.mxu1 %v1607_v12 }
 0xd0e   : > { %2127 = vmatmul.mubr.msk.f32.vlgmr.msra.gmra.mrb[8].mxu1 %vm1066_vm3, %v1604_v49  ;;  %1686 = vst.msk [vmem:[%s700_s22] sm:$0xff] %vm1685_vm7, %v1684_v13 }
 0xd0f   : > { %2597 = shalt.err (!%p2594_p2)
}
 0xd10   : > { %s2598_s26 = scalar_lea.hbm %s3331_s28, 128  ;;  %s2602_s4 = scalar_lea.hbm %s3496_s13, 256 }
 0xd11   : > { %p2599_p13 = scmp.ne.s32.totalorder %s3331_s28, %s2598_s26  ;;  %p2603_p0 = scmp.lt.u32.totalorder %s3331_s28, %s3496_s13 }
 0xd12   : > { %p2604_p8 = scmp.lt.u32.totalorder %s2602_s4, %s2598_s26  ;;  %p2606_p10 = scmp.lt.u32.totalorder %s2598_s26, %s3331_s28 }
 0xd13   : > { %p2600_p6 = pnand %p2599_p13, %p3497_p12 }
 0xd14   : > { %p2605_p4 = por %p2604_p8, %p2603_p0 }
 0xd15   : > { %p2601_p3 = pneg %p2600_p6 }
 0xd16   : > { %p2607_p1 = por %p2606_p10, %p2605_p4 }
 0xd18   : > { %p2608_p7 = pnand %p2607_p1, %p2601_p3 }
 0xd1a   : > { %2611 = shalt.err (!%p2608_p7)
}
 0xd1b   : > { %2203 = dma.vmem_to_hbm [thread:$0]  (%p3497_p12), %s1720_s18, 128, %s3331_s28, %s1693_s25   ;;  %vm1682_vm8 = vcmask 257024  }
 0xd1c   : > { %s1982_s15 = sshll.u32 %s2823_s24, 6  ;;  %s693_s22 = scalar_lea.vmem [#allocation17], %s1953_s1 }
 0xd1d   : > { %s1706_s27 = sshll.u32 %s693_s22, 4  ;;  %s3498_s5 = sld [smem:[#allocation43_spill]]  ;;  %s3359_s27 = int_to_ptr.vmem [resolvable:$true] %s1706_s27 }
 0xd1e   : > { %s1688_s9 = scalar_lea.sflag [#allocation4], %s3153_s17  ;;  %s2612_s18 = scalar_lea.vmem %s3359_s27, 64 }
 0xd1f   : > { %p2613_p9 = scmp.ne.s32.totalorder %s3359_s27, %s2612_s18  ;;  %s2721_s24 = smov [#allocation17]  }
 0xd20   : > { %s2616_s1 = sshll.u32 %s2721_s24, 4  ;;  %s2617_s1 = int_to_ptr.vmem [resolvable:$false] %s2616_s1 }
 0xd21   : > { %p2614_p11 = pnand %p2613_p9, %p3497_p12  ;;  %s2618_s28 = scalar_lea.vmem %s2617_s1, 128 }
 0xd22   : > { %p2619_p2 = scmp.lt.s32.totalorder %s3359_s27, %s2617_s1  ;;  %p2620_p13 = scmp.lt.s32.totalorder %s2618_s28, %s2612_s18 }
 0xd23   : > { %s3357_s11 = scalar_lea.hbm %s3498_s5, %s1982_s15  ;;  %p2615_p5 = pneg %p2614_p11 }
 0xd24   : > { %p2621_p6 = por %p2620_p13, %p2619_p2 }
 0xd26   : > { %p2622_p3 = pnand %p2621_p6, %p2615_p5 }
 0xde1   : > { %v1678_v14 = vpop.f32.mrb[8].mxu1 }
 0xde2   : > { %1683 = vst.msk [vmem:[%s693_s22] sm:$0xf] %vm1682_vm8, %v1678_v14  ;;  %v2128_v15 = vpop.f32.mrb[9].mxu1 }
 0xde3   : > { %2625 = shalt.err (!%p2622_p3)
}
 0xde4   : > { %s2626_s17 = scalar_lea.hbm %s3357_s11, 64  ;;  %s2630_s26 = scalar_lea.hbm %s3498_s5, 128 }
 0xde5   : > { %p2627_p0 = scmp.ne.s32.totalorder %s3357_s11, %s2626_s17  ;;  %p2631_p10 = scmp.lt.u32.totalorder %s3357_s11, %s3498_s5 }
 0xde6   : > { %p2632_p1 = scmp.lt.u32.totalorder %s2630_s26, %s2626_s17  ;;  %p2634_p9 = scmp.lt.u32.totalorder %s2626_s17, %s3357_s11 }
 0xde7   : > { %p2628_p8 = pnand %p2627_p0, %p3497_p12 }
 0xde8   : > { %p2633_p7 = por %p2632_p1, %p2631_p10 }
 0xde9   : > { %p2629_p4 = pneg %p2628_p8 }
 0xdea   : > { %p2635_p11 = por %p2634_p9, %p2633_p7 }
 0xdec   : > { %p2636_p5 = pnand %p2635_p11, %p2629_p4 }
 0xdee   : > { %2639 = shalt.err (!%p2636_p5)
}
 0xdef   : > { %2202 = dma.vmem_to_hbm [thread:$0]  (%p3497_p12), %s3359_s27, 64, %s3357_s11, %s1688_s9  }
 0xdf0 PF: > { %s3499_s4 = sld [smem:[#allocation28_spill]]  ;;  %s3500_s20 = sld [smem:[#allocation33_spill]] }
 0xdf1   : > { %p3502_p13 = scmp.ge.s32.totalorder %s2702_s21, 2 }
 0xdf6   : > { %s1731_s14 = sand.u32 1, %s3499_s4   ;;  %p3501_p2 = scmp.ne.s32.totalorder %s3500_s20, 0 }
 0xdf7   : > { %s1732_s15 = scalar_lea.sflag [#allocation4], %s1731_s14 }
 0xdf8   : > { %p2236_p6 = pnand %p3502_p13, %p3501_p2 }
 0xdfa   : > { %2681 = dma.done.wait (!%p2236_p6), %s1732_s15, 64  }
 0xdfb   : > { %2683 = vsyncadd (!%p2236_p6), %s1732_s15, 4294967232  ;;  %s1741_s22 = scalar_lea.sflag [#allocation19], %s1731_s14 }
 0xdfc   : > { %2685 = dma.done.wait (!%p2236_p6), %s1741_s22, 128  }
 0xdfd   : > { %2687 = vsyncadd (!%p2236_p6), %s1741_s22, 4294967168  ;;  %s3503_s21 = sld [smem:[#allocation30_spill]]  ;;  %s3504_s23 = sld [smem:[#allocation29_spill]] }
 0xdfe   : > { %s3505_s20 = sld [smem:[#allocation31_spill]]  ;;  %s3506_s18 = smov %s2694_s19 }
 0xe03   : > { %p40_p12 = scmp.ge.s32.totalorder %s3503_s21, 4   ;;  %s3507_s19 = smov %s3504_s23 }
 0xe05   :  { %42 = sbr.rel (!%p40_p12) target bundleno = 25 (0x19), region = 195 }
 0xe0c   :  { %1746 = vsyncpa [#allocation3], 1 }
 0xe0d   :  { %1748 = vsyncpa [#allocation3 + $0x1], 1 }
 0xe0e   :  { %1749 = vsyncpa [#allocation6], 1 }
 0xe0f   :  { %1751 = vsyncpa [#allocation6 + $0x1], 1 }
 0xe10   :  { %1752 = vsyncpa [#allocation9], 1 }
 0xe11   :  { %1754 = vsyncpa [#allocation9 + $0x1], 1 }
 0xe12   :  { %1755 = vsyncpa [#allocation12], 1 }
 0xe13   :  { %1756 = vsyncpa [#allocation15], 1 }
 0xe14   :  { %1757 = vsyncpa [#allocation4], 1 }
 0xe15   :  { %1759 = vsyncpa [#allocation4 + $0x1], 1 }
 0xe16   :  { %1760 = vsyncpa [#allocation19], 1 }
 0xe17   :  { %1762 = vsyncpa [#allocation19 + $0x1], 1 }

</bundles_post_ra>
